<compile_context>
chip_gen: v7x
topology: tpu7x:2x2x1
jax: 0.10.0
libtpu: 0.0.40
codegen_flags: <defaults>
</compile_context>

<pallas_src>
import jax
import jax.numpy as jnp
from jax.experimental import pallas as pl
from jax.experimental.pallas import tpu as pltpu

# Fully unroll the DMA issue/drain loops up to this many rows (trip count is a
# compile-time constant; unrolling gives the scheduler full visibility).
_UNROLL_LIMIT = 64


def _bigram_gather_kernel(idx_ref, emb_hbm, out_ref, sem):
    """out[n, :] = emb[idx[n], :] for n in [0, B*T), via overlapped DMA gather.

    idx_ref : SMEM (BT,) int32      (scalar prefetch)
    emb_hbm : HBM  (V, V) float32   (memory_space=pl.ANY, never tiled to VMEM)
    out_ref : VMEM (BT, V) float32  (lane-dense output block)
    sem     : DMA semaphores, shape (BT,)
    """
    BT, V = out_ref.shape

    def issue(n):
        # torch.nn.Embedding would raise on out-of-range ids; clamp deterministically.
        tok = jnp.clip(idx_ref[n], 0, V - 1)
        pltpu.make_async_copy(
            emb_hbm.at[pl.ds(tok, 1), :],   # (1, V) row of the table in HBM
            out_ref.at[pl.ds(n, 1), :],     # (1, V) row of the output in VMEM
            sem.at[n],
        ).start()

    def drain(n):
        # Descriptor only needs matching shapes for the byte-count; waits on sem[n].
        pltpu.make_async_copy(
            emb_hbm.at[pl.ds(0, 1), :],
            out_ref.at[pl.ds(n, 1), :],
            sem.at[n],
        ).wait()

    if BT <= _UNROLL_LIMIT:
        # Static unroll: all BT DMA starts issued back-to-back, then all waits.
        for n in range(BT):
            issue(n)
        for n in range(BT):
            drain(n)
    else:
        # Large-gather fallback: scalar scf.for loops (still overlap all DMAs).
        pl.loop(0, BT)(issue)
        pl.loop(0, BT)(drain)


@jax.jit
def bigram_forward(idx, emb_table):
    """idx: (B, T) integer tokens; emb_table: (V, V) float32. Returns (B, V, T)."""
    idx = idx.astype(jnp.int32)             # torch: idx.clone().type(torch.long)
    B, T = idx.shape
    V = emb_table.shape[0]
    BT = B * T
    idx_flat = idx.reshape(BT)

    cost = pl.CostEstimate(
        flops=0,
        transcendentals=0,
        bytes_accessed=2 * BT * V * 4 + BT * 4,   # gathered rows in+out, plus ids
    )

    gathered = pl.pallas_call(
        _bigram_gather_kernel,
        out_shape=jax.ShapeDtypeStruct((BT, V), emb_table.dtype),
        grid_spec=pltpu.PrefetchScalarGridSpec(
            num_scalar_prefetch=1,                         # idx_flat -> SMEM
            grid=(1,),                                     # single invocation
            in_specs=[pl.BlockSpec(memory_space=pl.ANY)],  # emb stays in HBM
            out_specs=pl.BlockSpec((BT, V), lambda i, idx: (0, 0)),
            scratch_shapes=[pltpu.SemaphoreType.DMA((BT,))],
        ),
        compiler_params=pltpu.CompilerParams(
            dimension_semantics=("arbitrary",),
        ),
        cost_estimate=cost,
    )(idx_flat, emb_table)

    # Lane-dense (BT, V) -> (B, T, V) -> permute(0, 2, 1) -> (B, V, T), done by XLA.
    return jnp.transpose(gathered.reshape(B, T, V), (0, 2, 1))


if __name__ == "__main__":
    vocab_size = 128   # V (lane-aligned)
    batch = 2          # B
    seq = 8            # T

    key = jax.random.PRNGKey(0)
    k_emb, k_idx = jax.random.split(key)

    # Deterministic "parameters": the (V, V) embedding table.
    emb_table = jax.random.normal(k_emb, (vocab_size, vocab_size), dtype=jnp.float32)
    # Token ids.
    idx = jax.random.randint(k_idx, (batch, seq), 0, vocab_size, dtype=jnp.int32)

    out = jax.block_until_ready(bigram_forward(idx, emb_table))

    # Reference check: emb[idx] then permute(0, 2, 1). DMA gather is bit-exact.
    ref = jnp.transpose(emb_table[idx], (0, 2, 1))
    assert out.shape == (batch, vocab_size, seq)
    assert jnp.allclose(out, ref, atol=0.0, rtol=0.0)

    print("KERNEL_OK")
</pallas_src>

<mosaic_0001>
module attributes {stable_mosaic.version = 11 : i64} {
  func.func @_bigram_gather_kernel(%arg0: i32, %arg1: memref<16xi32, #tpu.memory_space<smem>>, %arg2: memref<128x128xf32, #tpu.memory_space<any>>, %arg3: memref<16x128xf32, #tpu.memory_space<vmem>>, %arg4: memref<16x!tpu.dma_semaphore, #tpu.memory_space<semaphore_mem>>) attributes {dimension_semantics = [#tpu.dimension_semantics<arbitrary>], iteration_bounds = array<i64: 1>, scalar_prefetch = 1 : i64, scratch_operands = 1 : i64, tpu.core_type = #tpu.core_type<tc>, window_params = [{}, {pipeline_mode = #tpu.pipeline_mode<synchronous>, transform_indices = @transform_1, window_bounds = array<i64: 16, 128>}]} {
    %c0 = arith.constant 0 : index
    %0 = memref.load %arg1[%c0] : memref<16xi32, #tpu.memory_space<smem>>
    %c0_i32 = arith.constant 0 : i32
    %c127_i32 = arith.constant 127 : i32
    %1 = arith.maxsi %c0_i32, %0 : i32
    %2 = arith.minsi %c127_i32, %1 : i32
    %c0_i32_0 = arith.constant 0 : i32
    %c0_i32_1 = arith.constant 0 : i32
    %3 = tpu.memref_slice %arg2[%2, %c0_i32_1] : memref<128x128xf32, #tpu.memory_space<any>> -> memref<1x128xf32, #tpu.memory_space<any>>
    %c0_i32_2 = arith.constant 0 : i32
    %c0_i32_3 = arith.constant 0 : i32
    %4 = tpu.memref_slice %arg3[%c0_i32_2, %c0_i32_3] : memref<16x128xf32, #tpu.memory_space<vmem>> -> memref<1x128xf32, #tpu.memory_space<vmem>>
    %5 = tpu.memref_slice %arg4[%c0_i32_0] : memref<16x!tpu.dma_semaphore, #tpu.memory_space<semaphore_mem>> -> memref<1x!tpu.dma_semaphore, #tpu.memory_space<semaphore_mem>>
    %6 = tpu.memref_squeeze %5 : memref<1x!tpu.dma_semaphore, #tpu.memory_space<semaphore_mem>> -> memref<!tpu.dma_semaphore, #tpu.memory_space<semaphore_mem>>
    tpu.enqueue_dma source(%3 : memref<1x128xf32, #tpu.memory_space<any>>) target(%4 : memref<1x128xf32, #tpu.memory_space<vmem>>) target_semaphore(%6 : memref<!tpu.dma_semaphore, #tpu.memory_space<semaphore_mem>>)
    %c1 = arith.constant 1 : index
    %7 = memref.load %arg1[%c1] : memref<16xi32, #tpu.memory_space<smem>>
    %c0_i32_4 = arith.constant 0 : i32
    %c127_i32_5 = arith.constant 127 : i32
    %8 = arith.maxsi %c0_i32_4, %7 : i32
    %9 = arith.minsi %c127_i32_5, %8 : i32
    %c1_i32 = arith.constant 1 : i32
    %c0_i32_6 = arith.constant 0 : i32
    %10 = tpu.memref_slice %arg2[%9, %c0_i32_6] : memref<128x128xf32, #tpu.memory_space<any>> -> memref<1x128xf32, #tpu.memory_space<any>>
    %c1_i32_7 = arith.constant 1 : i32
    %c0_i32_8 = arith.constant 0 : i32
    %11 = tpu.memref_slice %arg3[%c1_i32_7, %c0_i32_8] : memref<16x128xf32, #tpu.memory_space<vmem>> -> memref<1x128xf32, #tpu.memory_space<vmem>>
    %12 = tpu.memref_slice %arg4[%c1_i32] : memref<16x!tpu.dma_semaphore, #tpu.memory_space<semaphore_mem>> -> memref<1x!tpu.dma_semaphore, #tpu.memory_space<semaphore_mem>>
    %13 = tpu.memref_squeeze %12 : memref<1x!tpu.dma_semaphore, #tpu.memory_space<semaphore_mem>> -> memref<!tpu.dma_semaphore, #tpu.memory_space<semaphore_mem>>
    tpu.enqueue_dma source(%10 : memref<1x128xf32, #tpu.memory_space<any>>) target(%11 : memref<1x128xf32, #tpu.memory_space<vmem>>) target_semaphore(%13 : memref<!tpu.dma_semaphore, #tpu.memory_space<semaphore_mem>>)
    %c2 = arith.constant 2 : index
    %14 = memref.load %arg1[%c2] : memref<16xi32, #tpu.memory_space<smem>>
    %c0_i32_9 = arith.constant 0 : i32
    %c127_i32_10 = arith.constant 127 : i32
    %15 = arith.maxsi %c0_i32_9, %14 : i32
    %16 = arith.minsi %c127_i32_10, %15 : i32
    %c2_i32 = arith.constant 2 : i32
    %c0_i32_11 = arith.constant 0 : i32
    %17 = tpu.memref_slice %arg2[%16, %c0_i32_11] : memref<128x128xf32, #tpu.memory_space<any>> -> memref<1x128xf32, #tpu.memory_space<any>>
    %c2_i32_12 = arith.constant 2 : i32
    %c0_i32_13 = arith.constant 0 : i32
    %18 = tpu.memref_slice %arg3[%c2_i32_12, %c0_i32_13] : memref<16x128xf32, #tpu.memory_space<vmem>> -> memref<1x128xf32, #tpu.memory_space<vmem>>
    %19 = tpu.memref_slice %arg4[%c2_i32] : memref<16x!tpu.dma_semaphore, #tpu.memory_space<semaphore_mem>> -> memref<1x!tpu.dma_semaphore, #tpu.memory_space<semaphore_mem>>
    %20 = tpu.memref_squeeze %19 : memref<1x!tpu.dma_semaphore, #tpu.memory_space<semaphore_mem>> -> memref<!tpu.dma_semaphore, #tpu.memory_space<semaphore_mem>>
    tpu.enqueue_dma source(%17 : memref<1x128xf32, #tpu.memory_space<any>>) target(%18 : memref<1x128xf32, #tpu.memory_space<vmem>>) target_semaphore(%20 : memref<!tpu.dma_semaphore, #tpu.memory_space<semaphore_mem>>)
    %c3 = arith.constant 3 : index
    %21 = memref.load %arg1[%c3] : memref<16xi32, #tpu.memory_space<smem>>
    %c0_i32_14 = arith.constant 0 : i32
    %c127_i32_15 = arith.constant 127 : i32
    %22 = arith.maxsi %c0_i32_14, %21 : i32
    %23 = arith.minsi %c127_i32_15, %22 : i32
    %c3_i32 = arith.constant 3 : i32
    %c0_i32_16 = arith.constant 0 : i32
    %24 = tpu.memref_slice %arg2[%23, %c0_i32_16] : memref<128x128xf32, #tpu.memory_space<any>> -> memref<1x128xf32, #tpu.memory_space<any>>
    %c3_i32_17 = arith.constant 3 : i32
    %c0_i32_18 = arith.constant 0 : i32
    %25 = tpu.memref_slice %arg3[%c3_i32_17, %c0_i32_18] : memref<16x128xf32, #tpu.memory_space<vmem>> -> memref<1x128xf32, #tpu.memory_space<vmem>>
    %26 = tpu.memref_slice %arg4[%c3_i32] : memref<16x!tpu.dma_semaphore, #tpu.memory_space<semaphore_mem>> -> memref<1x!tpu.dma_semaphore, #tpu.memory_space<semaphore_mem>>
    %27 = tpu.memref_squeeze %26 : memref<1x!tpu.dma_semaphore, #tpu.memory_space<semaphore_mem>> -> memref<!tpu.dma_semaphore, #tpu.memory_space<semaphore_mem>>
    tpu.enqueue_dma source(%24 : memref<1x128xf32, #tpu.memory_space<any>>) target(%25 : memref<1x128xf32, #tpu.memory_space<vmem>>) target_semaphore(%27 : memref<!tpu.dma_semaphore, #tpu.memory_space<semaphore_mem>>)
    %c4 = arith.constant 4 : index
    %28 = memref.load %arg1[%c4] : memref<16xi32, #tpu.memory_space<smem>>
    %c0_i32_19 = arith.constant 0 : i32
    %c127_i32_20 = arith.constant 127 : i32
    %29 = arith.maxsi %c0_i32_19, %28 : i32
    %30 = arith.minsi %c127_i32_20, %29 : i32
    %c4_i32 = arith.constant 4 : i32
    %c0_i32_21 = arith.constant 0 : i32
    %31 = tpu.memref_slice %arg2[%30, %c0_i32_21] : memref<128x128xf32, #tpu.memory_space<any>> -> memref<1x128xf32, #tpu.memory_space<any>>
    %c4_i32_22 = arith.constant 4 : i32
    %c0_i32_23 = arith.constant 0 : i32
    %32 = tpu.memref_slice %arg3[%c4_i32_22, %c0_i32_23] : memref<16x128xf32, #tpu.memory_space<vmem>> -> memref<1x128xf32, #tpu.memory_space<vmem>>
    %33 = tpu.memref_slice %arg4[%c4_i32] : memref<16x!tpu.dma_semaphore, #tpu.memory_space<semaphore_mem>> -> memref<1x!tpu.dma_semaphore, #tpu.memory_space<semaphore_mem>>
    %34 = tpu.memref_squeeze %33 : memref<1x!tpu.dma_semaphore, #tpu.memory_space<semaphore_mem>> -> memref<!tpu.dma_semaphore, #tpu.memory_space<semaphore_mem>>
    tpu.enqueue_dma source(%31 : memref<1x128xf32, #tpu.memory_space<any>>) target(%32 : memref<1x128xf32, #tpu.memory_space<vmem>>) target_semaphore(%34 : memref<!tpu.dma_semaphore, #tpu.memory_space<semaphore_mem>>)
    %c5 = arith.constant 5 : index
    %35 = memref.load %arg1[%c5] : memref<16xi32, #tpu.memory_space<smem>>
    %c0_i32_24 = arith.constant 0 : i32
    %c127_i32_25 = arith.constant 127 : i32
    %36 = arith.maxsi %c0_i32_24, %35 : i32
    %37 = arith.minsi %c127_i32_25, %36 : i32
    %c5_i32 = arith.constant 5 : i32
    %c0_i32_26 = arith.constant 0 : i32
    %38 = tpu.memref_slice %arg2[%37, %c0_i32_26] : memref<128x128xf32, #tpu.memory_space<any>> -> memref<1x128xf32, #tpu.memory_space<any>>
    %c5_i32_27 = arith.constant 5 : i32
    %c0_i32_28 = arith.constant 0 : i32
    %39 = tpu.memref_slice %arg3[%c5_i32_27, %c0_i32_28] : memref<16x128xf32, #tpu.memory_space<vmem>> -> memref<1x128xf32, #tpu.memory_space<vmem>>
    %40 = tpu.memref_slice %arg4[%c5_i32] : memref<16x!tpu.dma_semaphore, #tpu.memory_space<semaphore_mem>> -> memref<1x!tpu.dma_semaphore, #tpu.memory_space<semaphore_mem>>
    %41 = tpu.memref_squeeze %40 : memref<1x!tpu.dma_semaphore, #tpu.memory_space<semaphore_mem>> -> memref<!tpu.dma_semaphore, #tpu.memory_space<semaphore_mem>>
    tpu.enqueue_dma source(%38 : memref<1x128xf32, #tpu.memory_space<any>>) target(%39 : memref<1x128xf32, #tpu.memory_space<vmem>>) target_semaphore(%41 : memref<!tpu.dma_semaphore, #tpu.memory_space<semaphore_mem>>)
    %c6 = arith.constant 6 : index
    %42 = memref.load %arg1[%c6] : memref<16xi32, #tpu.memory_space<smem>>
    %c0_i32_29 = arith.constant 0 : i32
    %c127_i32_30 = arith.constant 127 : i32
    %43 = arith.maxsi %c0_i32_29, %42 : i32
    %44 = arith.minsi %c127_i32_30, %43 : i32
    %c6_i32 = arith.constant 6 : i32
    %c0_i32_31 = arith.constant 0 : i32
    %45 = tpu.memref_slice %arg2[%44, %c0_i32_31] : memref<128x128xf32, #tpu.memory_space<any>> -> memref<1x128xf32, #tpu.memory_space<any>>
    %c6_i32_32 = arith.constant 6 : i32
    %c0_i32_33 = arith.constant 0 : i32
    %46 = tpu.memref_slice %arg3[%c6_i32_32, %c0_i32_33] : memref<16x128xf32, #tpu.memory_space<vmem>> -> memref<1x128xf32, #tpu.memory_space<vmem>>
    %47 = tpu.memref_slice %arg4[%c6_i32] : memref<16x!tpu.dma_semaphore, #tpu.memory_space<semaphore_mem>> -> memref<1x!tpu.dma_semaphore, #tpu.memory_space<semaphore_mem>>
    %48 = tpu.memref_squeeze %47 : memref<1x!tpu.dma_semaphore, #tpu.memory_space<semaphore_mem>> -> memref<!tpu.dma_semaphore, #tpu.memory_space<semaphore_mem>>
    tpu.enqueue_dma source(%45 : memref<1x128xf32, #tpu.memory_space<any>>) target(%46 : memref<1x128xf32, #tpu.memory_space<vmem>>) target_semaphore(%48 : memref<!tpu.dma_semaphore, #tpu.memory_space<semaphore_mem>>)
    %c7 = arith.constant 7 : index
    %49 = memref.load %arg1[%c7] : memref<16xi32, #tpu.memory_space<smem>>
    %c0_i32_34 = arith.constant 0 : i32
    %c127_i32_35 = arith.constant 127 : i32
    %50 = arith.maxsi %c0_i32_34, %49 : i32
    %51 = arith.minsi %c127_i32_35, %50 : i32
    %c7_i32 = arith.constant 7 : i32
    %c0_i32_36 = arith.constant 0 : i32
    %52 = tpu.memref_slice %arg2[%51, %c0_i32_36] : memref<128x128xf32, #tpu.memory_space<any>> -> memref<1x128xf32, #tpu.memory_space<any>>
    %c7_i32_37 = arith.constant 7 : i32
    %c0_i32_38 = arith.constant 0 : i32
    %53 = tpu.memref_slice %arg3[%c7_i32_37, %c0_i32_38] : memref<16x128xf32, #tpu.memory_space<vmem>> -> memref<1x128xf32, #tpu.memory_space<vmem>>
    %54 = tpu.memref_slice %arg4[%c7_i32] : memref<16x!tpu.dma_semaphore, #tpu.memory_space<semaphore_mem>> -> memref<1x!tpu.dma_semaphore, #tpu.memory_space<semaphore_mem>>
    %55 = tpu.memref_squeeze %54 : memref<1x!tpu.dma_semaphore, #tpu.memory_space<semaphore_mem>> -> memref<!tpu.dma_semaphore, #tpu.memory_space<semaphore_mem>>
    tpu.enqueue_dma source(%52 : memref<1x128xf32, #tpu.memory_space<any>>) target(%53 : memref<1x128xf32, #tpu.memory_space<vmem>>) target_semaphore(%55 : memref<!tpu.dma_semaphore, #tpu.memory_space<semaphore_mem>>)
    %c8 = arith.constant 8 : index
    %56 = memref.load %arg1[%c8] : memref<16xi32, #tpu.memory_space<smem>>
    %c0_i32_39 = arith.constant 0 : i32
    %c127_i32_40 = arith.constant 127 : i32
    %57 = arith.maxsi %c0_i32_39, %56 : i32
    %58 = arith.minsi %c127_i32_40, %57 : i32
    %c8_i32 = arith.constant 8 : i32
    %c0_i32_41 = arith.constant 0 : i32
    %59 = tpu.memref_slice %arg2[%58, %c0_i32_41] : memref<128x128xf32, #tpu.memory_space<any>> -> memref<1x128xf32, #tpu.memory_space<any>>
    %c8_i32_42 = arith.constant 8 : i32
    %c0_i32_43 = arith.constant 0 : i32
    %60 = tpu.memref_slice %arg3[%c8_i32_42, %c0_i32_43] : memref<16x128xf32, #tpu.memory_space<vmem>> -> memref<1x128xf32, #tpu.memory_space<vmem>>
    %61 = tpu.memref_slice %arg4[%c8_i32] : memref<16x!tpu.dma_semaphore, #tpu.memory_space<semaphore_mem>> -> memref<1x!tpu.dma_semaphore, #tpu.memory_space<semaphore_mem>>
    %62 = tpu.memref_squeeze %61 : memref<1x!tpu.dma_semaphore, #tpu.memory_space<semaphore_mem>> -> memref<!tpu.dma_semaphore, #tpu.memory_space<semaphore_mem>>
    tpu.enqueue_dma source(%59 : memref<1x128xf32, #tpu.memory_space<any>>) target(%60 : memref<1x128xf32, #tpu.memory_space<vmem>>) target_semaphore(%62 : memref<!tpu.dma_semaphore, #tpu.memory_space<semaphore_mem>>)
    %c9 = arith.constant 9 : index
    %63 = memref.load %arg1[%c9] : memref<16xi32, #tpu.memory_space<smem>>
    %c0_i32_44 = arith.constant 0 : i32
    %c127_i32_45 = arith.constant 127 : i32
    %64 = arith.maxsi %c0_i32_44, %63 : i32
    %65 = arith.minsi %c127_i32_45, %64 : i32
    %c9_i32 = arith.constant 9 : i32
    %c0_i32_46 = arith.constant 0 : i32
    %66 = tpu.memref_slice %arg2[%65, %c0_i32_46] : memref<128x128xf32, #tpu.memory_space<any>> -> memref<1x128xf32, #tpu.memory_space<any>>
    %c9_i32_47 = arith.constant 9 : i32
    %c0_i32_48 = arith.constant 0 : i32
    %67 = tpu.memref_slice %arg3[%c9_i32_47, %c0_i32_48] : memref<16x128xf32, #tpu.memory_space<vmem>> -> memref<1x128xf32, #tpu.memory_space<vmem>>
    %68 = tpu.memref_slice %arg4[%c9_i32] : memref<16x!tpu.dma_semaphore, #tpu.memory_space<semaphore_mem>> -> memref<1x!tpu.dma_semaphore, #tpu.memory_space<semaphore_mem>>
    %69 = tpu.memref_squeeze %68 : memref<1x!tpu.dma_semaphore, #tpu.memory_space<semaphore_mem>> -> memref<!tpu.dma_semaphore, #tpu.memory_space<semaphore_mem>>
    tpu.enqueue_dma source(%66 : memref<1x128xf32, #tpu.memory_space<any>>) target(%67 : memref<1x128xf32, #tpu.memory_space<vmem>>) target_semaphore(%69 : memref<!tpu.dma_semaphore, #tpu.memory_space<semaphore_mem>>)
    %c10 = arith.constant 10 : index
    %70 = memref.load %arg1[%c10] : memref<16xi32, #tpu.memory_space<smem>>
    %c0_i32_49 = arith.constant 0 : i32
    %c127_i32_50 = arith.constant 127 : i32
    %71 = arith.maxsi %c0_i32_49, %70 : i32
    %72 = arith.minsi %c127_i32_50, %71 : i32
    %c10_i32 = arith.constant 10 : i32
    %c0_i32_51 = arith.constant 0 : i32
    %73 = tpu.memref_slice %arg2[%72, %c0_i32_51] : memref<128x128xf32, #tpu.memory_space<any>> -> memref<1x128xf32, #tpu.memory_space<any>>
    %c10_i32_52 = arith.constant 10 : i32
    %c0_i32_53 = arith.constant 0 : i32
    %74 = tpu.memref_slice %arg3[%c10_i32_52, %c0_i32_53] : memref<16x128xf32, #tpu.memory_space<vmem>> -> memref<1x128xf32, #tpu.memory_space<vmem>>
    %75 = tpu.memref_slice %arg4[%c10_i32] : memref<16x!tpu.dma_semaphore, #tpu.memory_space<semaphore_mem>> -> memref<1x!tpu.dma_semaphore, #tpu.memory_space<semaphore_mem>>
    %76 = tpu.memref_squeeze %75 : memref<1x!tpu.dma_semaphore, #tpu.memory_space<semaphore_mem>> -> memref<!tpu.dma_semaphore, #tpu.memory_space<semaphore_mem>>
    tpu.enqueue_dma source(%73 : memref<1x128xf32, #tpu.memory_space<any>>) target(%74 : memref<1x128xf32, #tpu.memory_space<vmem>>) target_semaphore(%76 : memref<!tpu.dma_semaphore, #tpu.memory_space<semaphore_mem>>)
    %c11 = arith.constant 11 : index
    %77 = memref.load %arg1[%c11] : memref<16xi32, #tpu.memory_space<smem>>
    %c0_i32_54 = arith.constant 0 : i32
    %c127_i32_55 = arith.constant 127 : i32
    %78 = arith.maxsi %c0_i32_54, %77 : i32
    %79 = arith.minsi %c127_i32_55, %78 : i32
    %c11_i32 = arith.constant 11 : i32
    %c0_i32_56 = arith.constant 0 : i32
    %80 = tpu.memref_slice %arg2[%79, %c0_i32_56] : memref<128x128xf32, #tpu.memory_space<any>> -> memref<1x128xf32, #tpu.memory_space<any>>
    %c11_i32_57 = arith.constant 11 : i32
    %c0_i32_58 = arith.constant 0 : i32
    %81 = tpu.memref_slice %arg3[%c11_i32_57, %c0_i32_58] : memref<16x128xf32, #tpu.memory_space<vmem>> -> memref<1x128xf32, #tpu.memory_space<vmem>>
    %82 = tpu.memref_slice %arg4[%c11_i32] : memref<16x!tpu.dma_semaphore, #tpu.memory_space<semaphore_mem>> -> memref<1x!tpu.dma_semaphore, #tpu.memory_space<semaphore_mem>>
    %83 = tpu.memref_squeeze %82 : memref<1x!tpu.dma_semaphore, #tpu.memory_space<semaphore_mem>> -> memref<!tpu.dma_semaphore, #tpu.memory_space<semaphore_mem>>
    tpu.enqueue_dma source(%80 : memref<1x128xf32, #tpu.memory_space<any>>) target(%81 : memref<1x128xf32, #tpu.memory_space<vmem>>) target_semaphore(%83 : memref<!tpu.dma_semaphore, #tpu.memory_space<semaphore_mem>>)
    %c12 = arith.constant 12 : index
    %84 = memref.load %arg1[%c12] : memref<16xi32, #tpu.memory_space<smem>>
    %c0_i32_59 = arith.constant 0 : i32
    %c127_i32_60 = arith.constant 127 : i32
    %85 = arith.maxsi %c0_i32_59, %84 : i32
    %86 = arith.minsi %c127_i32_60, %85 : i32
    %c12_i32 = arith.constant 12 : i32
    %c0_i32_61 = arith.constant 0 : i32
    %87 = tpu.memref_slice %arg2[%86, %c0_i32_61] : memref<128x128xf32, #tpu.memory_space<any>> -> memref<1x128xf32, #tpu.memory_space<any>>
    %c12_i32_62 = arith.constant 12 : i32
    %c0_i32_63 = arith.constant 0 : i32
    %88 = tpu.memref_slice %arg3[%c12_i32_62, %c0_i32_63] : memref<16x128xf32, #tpu.memory_space<vmem>> -> memref<1x128xf32, #tpu.memory_space<vmem>>
    %89 = tpu.memref_slice %arg4[%c12_i32] : memref<16x!tpu.dma_semaphore, #tpu.memory_space<semaphore_mem>> -> memref<1x!tpu.dma_semaphore, #tpu.memory_space<semaphore_mem>>
    %90 = tpu.memref_squeeze %89 : memref<1x!tpu.dma_semaphore, #tpu.memory_space<semaphore_mem>> -> memref<!tpu.dma_semaphore, #tpu.memory_space<semaphore_mem>>
    tpu.enqueue_dma source(%87 : memref<1x128xf32, #tpu.memory_space<any>>) target(%88 : memref<1x128xf32, #tpu.memory_space<vmem>>) target_semaphore(%90 : memref<!tpu.dma_semaphore, #tpu.memory_space<semaphore_mem>>)
    %c13 = arith.constant 13 : index
    %91 = memref.load %arg1[%c13] : memref<16xi32, #tpu.memory_space<smem>>
    %c0_i32_64 = arith.constant 0 : i32
    %c127_i32_65 = arith.constant 127 : i32
    %92 = arith.maxsi %c0_i32_64, %91 : i32
    %93 = arith.minsi %c127_i32_65, %92 : i32
    %c13_i32 = arith.constant 13 : i32
    %c0_i32_66 = arith.constant 0 : i32
    %94 = tpu.memref_slice %arg2[%93, %c0_i32_66] : memref<128x128xf32, #tpu.memory_space<any>> -> memref<1x128xf32, #tpu.memory_space<any>>
    %c13_i32_67 = arith.constant 13 : i32
    %c0_i32_68 = arith.constant 0 : i32
    %95 = tpu.memref_slice %arg3[%c13_i32_67, %c0_i32_68] : memref<16x128xf32, #tpu.memory_space<vmem>> -> memref<1x128xf32, #tpu.memory_space<vmem>>
    %96 = tpu.memref_slice %arg4[%c13_i32] : memref<16x!tpu.dma_semaphore, #tpu.memory_space<semaphore_mem>> -> memref<1x!tpu.dma_semaphore, #tpu.memory_space<semaphore_mem>>
    %97 = tpu.memref_squeeze %96 : memref<1x!tpu.dma_semaphore, #tpu.memory_space<semaphore_mem>> -> memref<!tpu.dma_semaphore, #tpu.memory_space<semaphore_mem>>
    tpu.enqueue_dma source(%94 : memref<1x128xf32, #tpu.memory_space<any>>) target(%95 : memref<1x128xf32, #tpu.memory_space<vmem>>) target_semaphore(%97 : memref<!tpu.dma_semaphore, #tpu.memory_space<semaphore_mem>>)
    %c14 = arith.constant 14 : index
    %98 = memref.load %arg1[%c14] : memref<16xi32, #tpu.memory_space<smem>>
    %c0_i32_69 = arith.constant 0 : i32
    %c127_i32_70 = arith.constant 127 : i32
    %99 = arith.maxsi %c0_i32_69, %98 : i32
    %100 = arith.minsi %c127_i32_70, %99 : i32
    %c14_i32 = arith.constant 14 : i32
    %c0_i32_71 = arith.constant 0 : i32
    %101 = tpu.memref_slice %arg2[%100, %c0_i32_71] : memref<128x128xf32, #tpu.memory_space<any>> -> memref<1x128xf32, #tpu.memory_space<any>>
    %c14_i32_72 = arith.constant 14 : i32
    %c0_i32_73 = arith.constant 0 : i32
    %102 = tpu.memref_slice %arg3[%c14_i32_72, %c0_i32_73] : memref<16x128xf32, #tpu.memory_space<vmem>> -> memref<1x128xf32, #tpu.memory_space<vmem>>
    %103 = tpu.memref_slice %arg4[%c14_i32] : memref<16x!tpu.dma_semaphore, #tpu.memory_space<semaphore_mem>> -> memref<1x!tpu.dma_semaphore, #tpu.memory_space<semaphore_mem>>
    %104 = tpu.memref_squeeze %103 : memref<1x!tpu.dma_semaphore, #tpu.memory_space<semaphore_mem>> -> memref<!tpu.dma_semaphore, #tpu.memory_space<semaphore_mem>>
    tpu.enqueue_dma source(%101 : memref<1x128xf32, #tpu.memory_space<any>>) target(%102 : memref<1x128xf32, #tpu.memory_space<vmem>>) target_semaphore(%104 : memref<!tpu.dma_semaphore, #tpu.memory_space<semaphore_mem>>)
    %c15 = arith.constant 15 : index
    %105 = memref.load %arg1[%c15] : memref<16xi32, #tpu.memory_space<smem>>
    %c0_i32_74 = arith.constant 0 : i32
    %c127_i32_75 = arith.constant 127 : i32
    %106 = arith.maxsi %c0_i32_74, %105 : i32
    %107 = arith.minsi %c127_i32_75, %106 : i32
    %c15_i32 = arith.constant 15 : i32
    %c0_i32_76 = arith.constant 0 : i32
    %108 = tpu.memref_slice %arg2[%107, %c0_i32_76] : memref<128x128xf32, #tpu.memory_space<any>> -> memref<1x128xf32, #tpu.memory_space<any>>
    %c15_i32_77 = arith.constant 15 : i32
    %c0_i32_78 = arith.constant 0 : i32
    %109 = tpu.memref_slice %arg3[%c15_i32_77, %c0_i32_78] : memref<16x128xf32, #tpu.memory_space<vmem>> -> memref<1x128xf32, #tpu.memory_space<vmem>>
    %110 = tpu.memref_slice %arg4[%c15_i32] : memref<16x!tpu.dma_semaphore, #tpu.memory_space<semaphore_mem>> -> memref<1x!tpu.dma_semaphore, #tpu.memory_space<semaphore_mem>>
    %111 = tpu.memref_squeeze %110 : memref<1x!tpu.dma_semaphore, #tpu.memory_space<semaphore_mem>> -> memref<!tpu.dma_semaphore, #tpu.memory_space<semaphore_mem>>
    tpu.enqueue_dma source(%108 : memref<1x128xf32, #tpu.memory_space<any>>) target(%109 : memref<1x128xf32, #tpu.memory_space<vmem>>) target_semaphore(%111 : memref<!tpu.dma_semaphore, #tpu.memory_space<semaphore_mem>>)
    %c0_i32_79 = arith.constant 0 : i32
    %c0_i32_80 = arith.constant 0 : i32
    %c0_i32_81 = arith.constant 0 : i32
    %112 = tpu.memref_slice %arg2[%c0_i32_80, %c0_i32_81] : memref<128x128xf32, #tpu.memory_space<any>> -> memref<1x128xf32, #tpu.memory_space<any>>
    %c0_i32_82 = arith.constant 0 : i32
    %c0_i32_83 = arith.constant 0 : i32
    %113 = tpu.memref_slice %arg3[%c0_i32_82, %c0_i32_83] : memref<16x128xf32, #tpu.memory_space<vmem>> -> memref<1x128xf32, #tpu.memory_space<vmem>>
    %114 = tpu.memref_slice %arg4[%c0_i32_79] : memref<16x!tpu.dma_semaphore, #tpu.memory_space<semaphore_mem>> -> memref<1x!tpu.dma_semaphore, #tpu.memory_space<semaphore_mem>>
    %115 = tpu.memref_squeeze %114 : memref<1x!tpu.dma_semaphore, #tpu.memory_space<semaphore_mem>> -> memref<!tpu.dma_semaphore, #tpu.memory_space<semaphore_mem>>
    tpu.wait_dma2 semaphore(%115 : memref<!tpu.dma_semaphore, #tpu.memory_space<semaphore_mem>>) src(%112 : memref<1x128xf32, #tpu.memory_space<any>>) dst(%113 : memref<1x128xf32, #tpu.memory_space<vmem>>)
    %c1_i32_84 = arith.constant 1 : i32
    %c0_i32_85 = arith.constant 0 : i32
    %c0_i32_86 = arith.constant 0 : i32
    %116 = tpu.memref_slice %arg2[%c0_i32_85, %c0_i32_86] : memref<128x128xf32, #tpu.memory_space<any>> -> memref<1x128xf32, #tpu.memory_space<any>>
    %c1_i32_87 = arith.constant 1 : i32
    %c0_i32_88 = arith.constant 0 : i32
    %117 = tpu.memref_slice %arg3[%c1_i32_87, %c0_i32_88] : memref<16x128xf32, #tpu.memory_space<vmem>> -> memref<1x128xf32, #tpu.memory_space<vmem>>
    %118 = tpu.memref_slice %arg4[%c1_i32_84] : memref<16x!tpu.dma_semaphore, #tpu.memory_space<semaphore_mem>> -> memref<1x!tpu.dma_semaphore, #tpu.memory_space<semaphore_mem>>
    %119 = tpu.memref_squeeze %118 : memref<1x!tpu.dma_semaphore, #tpu.memory_space<semaphore_mem>> -> memref<!tpu.dma_semaphore, #tpu.memory_space<semaphore_mem>>
    tpu.wait_dma2 semaphore(%119 : memref<!tpu.dma_semaphore, #tpu.memory_space<semaphore_mem>>) src(%116 : memref<1x128xf32, #tpu.memory_space<any>>) dst(%117 : memref<1x128xf32, #tpu.memory_space<vmem>>)
    %c2_i32_89 = arith.constant 2 : i32
    %c0_i32_90 = arith.constant 0 : i32
    %c0_i32_91 = arith.constant 0 : i32
    %120 = tpu.memref_slice %arg2[%c0_i32_90, %c0_i32_91] : memref<128x128xf32, #tpu.memory_space<any>> -> memref<1x128xf32, #tpu.memory_space<any>>
    %c2_i32_92 = arith.constant 2 : i32
    %c0_i32_93 = arith.constant 0 : i32
    %121 = tpu.memref_slice %arg3[%c2_i32_92, %c0_i32_93] : memref<16x128xf32, #tpu.memory_space<vmem>> -> memref<1x128xf32, #tpu.memory_space<vmem>>
    %122 = tpu.memref_slice %arg4[%c2_i32_89] : memref<16x!tpu.dma_semaphore, #tpu.memory_space<semaphore_mem>> -> memref<1x!tpu.dma_semaphore, #tpu.memory_space<semaphore_mem>>
    %123 = tpu.memref_squeeze %122 : memref<1x!tpu.dma_semaphore, #tpu.memory_space<semaphore_mem>> -> memref<!tpu.dma_semaphore, #tpu.memory_space<semaphore_mem>>
    tpu.wait_dma2 semaphore(%123 : memref<!tpu.dma_semaphore, #tpu.memory_space<semaphore_mem>>) src(%120 : memref<1x128xf32, #tpu.memory_space<any>>) dst(%121 : memref<1x128xf32, #tpu.memory_space<vmem>>)
    %c3_i32_94 = arith.constant 3 : i32
    %c0_i32_95 = arith.constant 0 : i32
    %c0_i32_96 = arith.constant 0 : i32
    %124 = tpu.memref_slice %arg2[%c0_i32_95, %c0_i32_96] : memref<128x128xf32, #tpu.memory_space<any>> -> memref<1x128xf32, #tpu.memory_space<any>>
    %c3_i32_97 = arith.constant 3 : i32
    %c0_i32_98 = arith.constant 0 : i32
    %125 = tpu.memref_slice %arg3[%c3_i32_97, %c0_i32_98] : memref<16x128xf32, #tpu.memory_space<vmem>> -> memref<1x128xf32, #tpu.memory_space<vmem>>
    %126 = tpu.memref_slice %arg4[%c3_i32_94] : memref<16x!tpu.dma_semaphore, #tpu.memory_space<semaphore_mem>> -> memref<1x!tpu.dma_semaphore, #tpu.memory_space<semaphore_mem>>
    %127 = tpu.memref_squeeze %126 : memref<1x!tpu.dma_semaphore, #tpu.memory_space<semaphore_mem>> -> memref<!tpu.dma_semaphore, #tpu.memory_space<semaphore_mem>>
    tpu.wait_dma2 semaphore(%127 : memref<!tpu.dma_semaphore, #tpu.memory_space<semaphore_mem>>) src(%124 : memref<1x128xf32, #tpu.memory_space<any>>) dst(%125 : memref<1x128xf32, #tpu.memory_space<vmem>>)
    %c4_i32_99 = arith.constant 4 : i32
    %c0_i32_100 = arith.constant 0 : i32
    %c0_i32_101 = arith.constant 0 : i32
    %128 = tpu.memref_slice %arg2[%c0_i32_100, %c0_i32_101] : memref<128x128xf32, #tpu.memory_space<any>> -> memref<1x128xf32, #tpu.memory_space<any>>
    %c4_i32_102 = arith.constant 4 : i32
    %c0_i32_103 = arith.constant 0 : i32
    %129 = tpu.memref_slice %arg3[%c4_i32_102, %c0_i32_103] : memref<16x128xf32, #tpu.memory_space<vmem>> -> memref<1x128xf32, #tpu.memory_space<vmem>>
    %130 = tpu.memref_slice %arg4[%c4_i32_99] : memref<16x!tpu.dma_semaphore, #tpu.memory_space<semaphore_mem>> -> memref<1x!tpu.dma_semaphore, #tpu.memory_space<semaphore_mem>>
    %131 = tpu.memref_squeeze %130 : memref<1x!tpu.dma_semaphore, #tpu.memory_space<semaphore_mem>> -> memref<!tpu.dma_semaphore, #tpu.memory_space<semaphore_mem>>
    tpu.wait_dma2 semaphore(%131 : memref<!tpu.dma_semaphore, #tpu.memory_space<semaphore_mem>>) src(%128 : memref<1x128xf32, #tpu.memory_space<any>>) dst(%129 : memref<1x128xf32, #tpu.memory_space<vmem>>)
    %c5_i32_104 = arith.constant 5 : i32
    %c0_i32_105 = arith.constant 0 : i32
    %c0_i32_106 = arith.constant 0 : i32
    %132 = tpu.memref_slice %arg2[%c0_i32_105, %c0_i32_106] : memref<128x128xf32, #tpu.memory_space<any>> -> memref<1x128xf32, #tpu.memory_space<any>>
    %c5_i32_107 = arith.constant 5 : i32
    %c0_i32_108 = arith.constant 0 : i32
    %133 = tpu.memref_slice %arg3[%c5_i32_107, %c0_i32_108] : memref<16x128xf32, #tpu.memory_space<vmem>> -> memref<1x128xf32, #tpu.memory_space<vmem>>
    %134 = tpu.memref_slice %arg4[%c5_i32_104] : memref<16x!tpu.dma_semaphore, #tpu.memory_space<semaphore_mem>> -> memref<1x!tpu.dma_semaphore, #tpu.memory_space<semaphore_mem>>
    %135 = tpu.memref_squeeze %134 : memref<1x!tpu.dma_semaphore, #tpu.memory_space<semaphore_mem>> -> memref<!tpu.dma_semaphore, #tpu.memory_space<semaphore_mem>>
    tpu.wait_dma2 semaphore(%135 : memref<!tpu.dma_semaphore, #tpu.memory_space<semaphore_mem>>) src(%132 : memref<1x128xf32, #tpu.memory_space<any>>) dst(%133 : memref<1x128xf32, #tpu.memory_space<vmem>>)
    %c6_i32_109 = arith.constant 6 : i32
    %c0_i32_110 = arith.constant 0 : i32
    %c0_i32_111 = arith.constant 0 : i32
    %136 = tpu.memref_slice %arg2[%c0_i32_110, %c0_i32_111] : memref<128x128xf32, #tpu.memory_space<any>> -> memref<1x128xf32, #tpu.memory_space<any>>
    %c6_i32_112 = arith.constant 6 : i32
    %c0_i32_113 = arith.constant 0 : i32
    %137 = tpu.memref_slice %arg3[%c6_i32_112, %c0_i32_113] : memref<16x128xf32, #tpu.memory_space<vmem>> -> memref<1x128xf32, #tpu.memory_space<vmem>>
    %138 = tpu.memref_slice %arg4[%c6_i32_109] : memref<16x!tpu.dma_semaphore, #tpu.memory_space<semaphore_mem>> -> memref<1x!tpu.dma_semaphore, #tpu.memory_space<semaphore_mem>>
    %139 = tpu.memref_squeeze %138 : memref<1x!tpu.dma_semaphore, #tpu.memory_space<semaphore_mem>> -> memref<!tpu.dma_semaphore, #tpu.memory_space<semaphore_mem>>
    tpu.wait_dma2 semaphore(%139 : memref<!tpu.dma_semaphore, #tpu.memory_space<semaphore_mem>>) src(%136 : memref<1x128xf32, #tpu.memory_space<any>>) dst(%137 : memref<1x128xf32, #tpu.memory_space<vmem>>)
    %c7_i32_114 = arith.constant 7 : i32
    %c0_i32_115 = arith.constant 0 : i32
    %c0_i32_116 = arith.constant 0 : i32
    %140 = tpu.memref_slice %arg2[%c0_i32_115, %c0_i32_116] : memref<128x128xf32, #tpu.memory_space<any>> -> memref<1x128xf32, #tpu.memory_space<any>>
    %c7_i32_117 = arith.constant 7 : i32
    %c0_i32_118 = arith.constant 0 : i32
    %141 = tpu.memref_slice %arg3[%c7_i32_117, %c0_i32_118] : memref<16x128xf32, #tpu.memory_space<vmem>> -> memref<1x128xf32, #tpu.memory_space<vmem>>
    %142 = tpu.memref_slice %arg4[%c7_i32_114] : memref<16x!tpu.dma_semaphore, #tpu.memory_space<semaphore_mem>> -> memref<1x!tpu.dma_semaphore, #tpu.memory_space<semaphore_mem>>
    %143 = tpu.memref_squeeze %142 : memref<1x!tpu.dma_semaphore, #tpu.memory_space<semaphore_mem>> -> memref<!tpu.dma_semaphore, #tpu.memory_space<semaphore_mem>>
    tpu.wait_dma2 semaphore(%143 : memref<!tpu.dma_semaphore, #tpu.memory_space<semaphore_mem>>) src(%140 : memref<1x128xf32, #tpu.memory_space<any>>) dst(%141 : memref<1x128xf32, #tpu.memory_space<vmem>>)
    %c8_i32_119 = arith.constant 8 : i32
    %c0_i32_120 = arith.constant 0 : i32
    %c0_i32_121 = arith.constant 0 : i32
    %144 = tpu.memref_slice %arg2[%c0_i32_120, %c0_i32_121] : memref<128x128xf32, #tpu.memory_space<any>> -> memref<1x128xf32, #tpu.memory_space<any>>
    %c8_i32_122 = arith.constant 8 : i32
    %c0_i32_123 = arith.constant 0 : i32
    %145 = tpu.memref_slice %arg3[%c8_i32_122, %c0_i32_123] : memref<16x128xf32, #tpu.memory_space<vmem>> -> memref<1x128xf32, #tpu.memory_space<vmem>>
    %146 = tpu.memref_slice %arg4[%c8_i32_119] : memref<16x!tpu.dma_semaphore, #tpu.memory_space<semaphore_mem>> -> memref<1x!tpu.dma_semaphore, #tpu.memory_space<semaphore_mem>>
    %147 = tpu.memref_squeeze %146 : memref<1x!tpu.dma_semaphore, #tpu.memory_space<semaphore_mem>> -> memref<!tpu.dma_semaphore, #tpu.memory_space<semaphore_mem>>
    tpu.wait_dma2 semaphore(%147 : memref<!tpu.dma_semaphore, #tpu.memory_space<semaphore_mem>>) src(%144 : memref<1x128xf32, #tpu.memory_space<any>>) dst(%145 : memref<1x128xf32, #tpu.memory_space<vmem>>)
    %c9_i32_124 = arith.constant 9 : i32
    %c0_i32_125 = arith.constant 0 : i32
    %c0_i32_126 = arith.constant 0 : i32
    %148 = tpu.memref_slice %arg2[%c0_i32_125, %c0_i32_126] : memref<128x128xf32, #tpu.memory_space<any>> -> memref<1x128xf32, #tpu.memory_space<any>>
    %c9_i32_127 = arith.constant 9 : i32
    %c0_i32_128 = arith.constant 0 : i32
    %149 = tpu.memref_slice %arg3[%c9_i32_127, %c0_i32_128] : memref<16x128xf32, #tpu.memory_space<vmem>> -> memref<1x128xf32, #tpu.memory_space<vmem>>
    %150 = tpu.memref_slice %arg4[%c9_i32_124] : memref<16x!tpu.dma_semaphore, #tpu.memory_space<semaphore_mem>> -> memref<1x!tpu.dma_semaphore, #tpu.memory_space<semaphore_mem>>
    %151 = tpu.memref_squeeze %150 : memref<1x!tpu.dma_semaphore, #tpu.memory_space<semaphore_mem>> -> memref<!tpu.dma_semaphore, #tpu.memory_space<semaphore_mem>>
    tpu.wait_dma2 semaphore(%151 : memref<!tpu.dma_semaphore, #tpu.memory_space<semaphore_mem>>) src(%148 : memref<1x128xf32, #tpu.memory_space<any>>) dst(%149 : memref<1x128xf32, #tpu.memory_space<vmem>>)
    %c10_i32_129 = arith.constant 10 : i32
    %c0_i32_130 = arith.constant 0 : i32
    %c0_i32_131 = arith.constant 0 : i32
    %152 = tpu.memref_slice %arg2[%c0_i32_130, %c0_i32_131] : memref<128x128xf32, #tpu.memory_space<any>> -> memref<1x128xf32, #tpu.memory_space<any>>
    %c10_i32_132 = arith.constant 10 : i32
    %c0_i32_133 = arith.constant 0 : i32
    %153 = tpu.memref_slice %arg3[%c10_i32_132, %c0_i32_133] : memref<16x128xf32, #tpu.memory_space<vmem>> -> memref<1x128xf32, #tpu.memory_space<vmem>>
    %154 = tpu.memref_slice %arg4[%c10_i32_129] : memref<16x!tpu.dma_semaphore, #tpu.memory_space<semaphore_mem>> -> memref<1x!tpu.dma_semaphore, #tpu.memory_space<semaphore_mem>>
    %155 = tpu.memref_squeeze %154 : memref<1x!tpu.dma_semaphore, #tpu.memory_space<semaphore_mem>> -> memref<!tpu.dma_semaphore, #tpu.memory_space<semaphore_mem>>
    tpu.wait_dma2 semaphore(%155 : memref<!tpu.dma_semaphore, #tpu.memory_space<semaphore_mem>>) src(%152 : memref<1x128xf32, #tpu.memory_space<any>>) dst(%153 : memref<1x128xf32, #tpu.memory_space<vmem>>)
    %c11_i32_134 = arith.constant 11 : i32
    %c0_i32_135 = arith.constant 0 : i32
    %c0_i32_136 = arith.constant 0 : i32
    %156 = tpu.memref_slice %arg2[%c0_i32_135, %c0_i32_136] : memref<128x128xf32, #tpu.memory_space<any>> -> memref<1x128xf32, #tpu.memory_space<any>>
    %c11_i32_137 = arith.constant 11 : i32
    %c0_i32_138 = arith.constant 0 : i32
    %157 = tpu.memref_slice %arg3[%c11_i32_137, %c0_i32_138] : memref<16x128xf32, #tpu.memory_space<vmem>> -> memref<1x128xf32, #tpu.memory_space<vmem>>
    %158 = tpu.memref_slice %arg4[%c11_i32_134] : memref<16x!tpu.dma_semaphore, #tpu.memory_space<semaphore_mem>> -> memref<1x!tpu.dma_semaphore, #tpu.memory_space<semaphore_mem>>
    %159 = tpu.memref_squeeze %158 : memref<1x!tpu.dma_semaphore, #tpu.memory_space<semaphore_mem>> -> memref<!tpu.dma_semaphore, #tpu.memory_space<semaphore_mem>>
    tpu.wait_dma2 semaphore(%159 : memref<!tpu.dma_semaphore, #tpu.memory_space<semaphore_mem>>) src(%156 : memref<1x128xf32, #tpu.memory_space<any>>) dst(%157 : memref<1x128xf32, #tpu.memory_space<vmem>>)
    %c12_i32_139 = arith.constant 12 : i32
    %c0_i32_140 = arith.constant 0 : i32
    %c0_i32_141 = arith.constant 0 : i32
    %160 = tpu.memref_slice %arg2[%c0_i32_140, %c0_i32_141] : memref<128x128xf32, #tpu.memory_space<any>> -> memref<1x128xf32, #tpu.memory_space<any>>
    %c12_i32_142 = arith.constant 12 : i32
    %c0_i32_143 = arith.constant 0 : i32
    %161 = tpu.memref_slice %arg3[%c12_i32_142, %c0_i32_143] : memref<16x128xf32, #tpu.memory_space<vmem>> -> memref<1x128xf32, #tpu.memory_space<vmem>>
    %162 = tpu.memref_slice %arg4[%c12_i32_139] : memref<16x!tpu.dma_semaphore, #tpu.memory_space<semaphore_mem>> -> memref<1x!tpu.dma_semaphore, #tpu.memory_space<semaphore_mem>>
    %163 = tpu.memref_squeeze %162 : memref<1x!tpu.dma_semaphore, #tpu.memory_space<semaphore_mem>> -> memref<!tpu.dma_semaphore, #tpu.memory_space<semaphore_mem>>
    tpu.wait_dma2 semaphore(%163 : memref<!tpu.dma_semaphore, #tpu.memory_space<semaphore_mem>>) src(%160 : memref<1x128xf32, #tpu.memory_space<any>>) dst(%161 : memref<1x128xf32, #tpu.memory_space<vmem>>)
    %c13_i32_144 = arith.constant 13 : i32
    %c0_i32_145 = arith.constant 0 : i32
    %c0_i32_146 = arith.constant 0 : i32
    %164 = tpu.memref_slice %arg2[%c0_i32_145, %c0_i32_146] : memref<128x128xf32, #tpu.memory_space<any>> -> memref<1x128xf32, #tpu.memory_space<any>>
    %c13_i32_147 = arith.constant 13 : i32
    %c0_i32_148 = arith.constant 0 : i32
    %165 = tpu.memref_slice %arg3[%c13_i32_147, %c0_i32_148] : memref<16x128xf32, #tpu.memory_space<vmem>> -> memref<1x128xf32, #tpu.memory_space<vmem>>
    %166 = tpu.memref_slice %arg4[%c13_i32_144] : memref<16x!tpu.dma_semaphore, #tpu.memory_space<semaphore_mem>> -> memref<1x!tpu.dma_semaphore, #tpu.memory_space<semaphore_mem>>
    %167 = tpu.memref_squeeze %166 : memref<1x!tpu.dma_semaphore, #tpu.memory_space<semaphore_mem>> -> memref<!tpu.dma_semaphore, #tpu.memory_space<semaphore_mem>>
    tpu.wait_dma2 semaphore(%167 : memref<!tpu.dma_semaphore, #tpu.memory_space<semaphore_mem>>) src(%164 : memref<1x128xf32, #tpu.memory_space<any>>) dst(%165 : memref<1x128xf32, #tpu.memory_space<vmem>>)
    %c14_i32_149 = arith.constant 14 : i32
    %c0_i32_150 = arith.constant 0 : i32
    %c0_i32_151 = arith.constant 0 : i32
    %168 = tpu.memref_slice %arg2[%c0_i32_150, %c0_i32_151] : memref<128x128xf32, #tpu.memory_space<any>> -> memref<1x128xf32, #tpu.memory_space<any>>
    %c14_i32_152 = arith.constant 14 : i32
    %c0_i32_153 = arith.constant 0 : i32
    %169 = tpu.memref_slice %arg3[%c14_i32_152, %c0_i32_153] : memref<16x128xf32, #tpu.memory_space<vmem>> -> memref<1x128xf32, #tpu.memory_space<vmem>>
    %170 = tpu.memref_slice %arg4[%c14_i32_149] : memref<16x!tpu.dma_semaphore, #tpu.memory_space<semaphore_mem>> -> memref<1x!tpu.dma_semaphore, #tpu.memory_space<semaphore_mem>>
    %171 = tpu.memref_squeeze %170 : memref<1x!tpu.dma_semaphore, #tpu.memory_space<semaphore_mem>> -> memref<!tpu.dma_semaphore, #tpu.memory_space<semaphore_mem>>
    tpu.wait_dma2 semaphore(%171 : memref<!tpu.dma_semaphore, #tpu.memory_space<semaphore_mem>>) src(%168 : memref<1x128xf32, #tpu.memory_space<any>>) dst(%169 : memref<1x128xf32, #tpu.memory_space<vmem>>)
    %c15_i32_154 = arith.constant 15 : i32
    %c0_i32_155 = arith.constant 0 : i32
    %c0_i32_156 = arith.constant 0 : i32
    %172 = tpu.memref_slice %arg2[%c0_i32_155, %c0_i32_156] : memref<128x128xf32, #tpu.memory_space<any>> -> memref<1x128xf32, #tpu.memory_space<any>>
    %c15_i32_157 = arith.constant 15 : i32
    %c0_i32_158 = arith.constant 0 : i32
    %173 = tpu.memref_slice %arg3[%c15_i32_157, %c0_i32_158] : memref<16x128xf32, #tpu.memory_space<vmem>> -> memref<1x128xf32, #tpu.memory_space<vmem>>
    %174 = tpu.memref_slice %arg4[%c15_i32_154] : memref<16x!tpu.dma_semaphore, #tpu.memory_space<semaphore_mem>> -> memref<1x!tpu.dma_semaphore, #tpu.memory_space<semaphore_mem>>
    %175 = tpu.memref_squeeze %174 : memref<1x!tpu.dma_semaphore, #tpu.memory_space<semaphore_mem>> -> memref<!tpu.dma_semaphore, #tpu.memory_space<semaphore_mem>>
    tpu.wait_dma2 semaphore(%175 : memref<!tpu.dma_semaphore, #tpu.memory_space<semaphore_mem>>) src(%172 : memref<1x128xf32, #tpu.memory_space<any>>) dst(%173 : memref<1x128xf32, #tpu.memory_space<vmem>>)
    return
  }
  func.func @transform_1(%arg0: i32, %arg1: memref<16xi32, #tpu.memory_space<smem>>) -> (i32, i32) {
    %c0_i32 = arith.constant 0 : i32
    %c0_i32_0 = arith.constant 0 : i32
    %c0_i32_1 = arith.constant 0 : i32
    return %c0_i32, %c0_i32_0 : i32, i32
  }
}

</mosaic_0001>

<bundles_post_ra>
// kernel: bigram_forward.1
= control target key start
LH: loop header
LB: loop body
LE: loop exit
PB: predicated region body
PF: predicated region fallthrough
CT: control target
= control target key end

     0   :  { %s1542_s0 = inlined_call_operand.vmem [shape: s32[16], index: 0, kind: input, shape index: {}]   ;;  %s1543_s1 = inlined_call_operand.hbm [shape: f32[128,128], index: 1, kind: input, shape index: {}]   ;;  %s1544_s2 = inlined_call_operand.hbm [shape: f32[16,128], index: 2, kind: output, shape index: {}]  }
   0x1   :  { %s7_s11 = sshll.u32 %s1542_s0, 4  ;;  %s8_s11 = int_to_ptr.vmem [resolvable:$true] %s7_s11 }
   0x2   :  { %s702_s12 = scalar_lea.vmem %s8_s11, 16  ;;  %p707_p1 = scmp.lt.s32.totalorder %s8_s11, %s8_s11 }
   0x3   :  { %p703_p0 = scmp.ne.s32.totalorder %s8_s11, %s702_s12  ;;  %p708_p2 = scmp.lt.s32.totalorder %s702_s12, %s702_s12 }
   0x5   :  { %p709_p3 = por %p708_p2, %p707_p1 }
   0x7   :  { %p710_p4 = pnand %p709_p3, %p703_p0 }
   0x9   :  { %713 = shalt.err (!%p710_p4)  }
   0xa   :  { %s1156_s13 = smov [#allocation4]  }
   0xb   :  { %10 = dma.vmem_to_smem %s8_s11, 16, %s1156_s13, [#allocation3] }
   0xc   :  { %1120 = dma.done.wait [#allocation3], 16 }
   0xd   :  { %1121 = vsyncadd [#allocation3], 4294967280 }
   0xe   :  { %12 = sfence }
   0xf   :  { %13 = vsyncpa [#allocation6], 0  ;;  %s14_s14 = sld [smem:[#allocation4]]  ;;  %s1157_s15 = smov [#allocation5]  }
  0x10   :  { %s28_s16 = sshll.u32 %s1157_s15, 4  ;;  %s530_s17 = sld [smem:[#allocation4 + $0x1]]  ;;  %s1193_s16 = int_to_ptr.vmem [resolvable:$true] %s28_s16 }
  0x11   :  { %s1158_s0 = smov [#allocation5 + $0x1]   ;;  %s1195_s19 = sld [smem:[#allocation4 + $0x2]] }
  0x12   :  { %s48_s18 = sshll.u32 %s1158_s0, 4  ;;  %s1159_s20 = smov [#allocation5 + $0x2]   ;;  %s1197_s18 = int_to_ptr.vmem [resolvable:$true] %s48_s18 }
  0x13   :  { %s1199_s21 = sshll.u32 %s1159_s20, 4  ;;  %s1201_s22 = sld [smem:[#allocation4 + $0x3]]  ;;  %s69_s21 = int_to_ptr.vmem [resolvable:$true] %s1199_s21 }
  0x14   :  { %s1210_s3 = scalar_lea.hbm %s1543_s1, 2048 }
  0x15   :  { %p15_p5 = scmp.gt.s32.totalorder %s14_s14, 0  ;;  %p524_p6 = scmp.lt.s32.totalorder %s14_s14, 127 }
  0x16   :  { %p33_p7 = scmp.gt.s32.totalorder %s530_s17, 0  ;;  %p531_p8 = scmp.lt.s32.totalorder %s530_s17, 127 }
  0x17   :  { %s1551_s14 = smov (!%p15_p5, %s14_s14), 0  ;;  %p53_p9 = scmp.gt.s32.totalorder %s1195_s19, 0 }
  0x18   :  { %s1553_s17 = smov (!%p33_p7, %s530_s17), 0  ;;  %s1555_s14 = smov (!%p524_p6, %s1551_s14), 127 }
  0x19   :  { %s1557_s17 = smov (!%p531_p8, %s1553_s17), 127  ;;  %s529_s23 = sshll.u32 %s1555_s14, 4 }
  0x1a   :  { %s20_s26 = scalar_lea.hbm %s1543_s1, %s529_s23  ;;  %s536_s27 = sshll.u32 %s1557_s17, 4 }
  0x1b   :  { %s714_s28 = scalar_lea.hbm %s20_s26, 16  ;;  %p717_p11 = scmp.lt.u32.totalorder %s20_s26, %s1543_s1 }
  0x1c   :  { %p715_p10 = scmp.ne.s32.totalorder %s20_s26, %s714_s28  ;;  %p718_p12 = scmp.lt.u32.totalorder %s1210_s3, %s714_s28 }
  0x1d   :  { %p720_p0 = scmp.lt.u32.totalorder %s714_s28, %s20_s26 }
  0x1e   :  { %p719_p13 = por %p718_p12, %p717_p11 }
  0x20   :  { %p721_p1 = por %p720_p0, %p719_p13 }
  0x22   :  { %p722_p2 = pnand %p721_p1, %p715_p10 }
  0x24   :  { %725 = shalt.err (!%p722_p2)  }
  0x25   :  { %s726_s6 = scalar_lea.vmem %s1193_s16, 16  ;;  %s1219_s7 = scalar_lea.vmem %s1193_s16, 256 }
  0x26   :  { %p727_p3 = scmp.ne.s32.totalorder %s1193_s16, %s726_s6  ;;  %p1545_p4 = scmp.lt.s32.totalorder %s1193_s16, %s1193_s16 }
  0x27   :  { %p732_p5 = scmp.lt.s32.totalorder %s1219_s7, %s726_s6 }
  0x29   :  { %p733_p6 = por %p732_p5, %p1545_p4 }
  0x2b   :  { %p734_p7 = pnand %p733_p6, %p727_p3 }
  0x2d   :  { %737 = shalt.err (!%p734_p7)  }
  0x2e   :  { %31 = dma.hbm_to_vmem [thread:$0]  %s20_s26, 16, %s1193_s16, [#allocation2] }
  0x2f   :  { %s38_s10 = scalar_lea.hbm %s1543_s1, %s536_s27  ;;  %p538_p8 = scmp.lt.s32.totalorder %s1195_s19, 127 }
  0x30   :  { %s738_s11 = scalar_lea.hbm %s38_s10, 16  ;;  %p741_p11 = scmp.lt.u32.totalorder %s38_s10, %s1543_s1 }
  0x31   :  { %p739_p10 = scmp.ne.s32.totalorder %s38_s10, %s738_s11  ;;  %p742_p12 = scmp.lt.u32.totalorder %s1210_s3, %s738_s11 }
  0x32   :  { %p744_p0 = scmp.lt.u32.totalorder %s738_s11, %s38_s10 }
  0x33   :  { %p743_p13 = por %p742_p12, %p741_p11 }
  0x35   :  { %p745_p1 = por %p744_p0, %p743_p13 }
  0x37   :  { %p746_p2 = pnand %p745_p1, %p739_p10 }
  0x39   :  { %749 = shalt.err (!%p746_p2)  }
  0x3a   :  { %s750_s14 = scalar_lea.vmem %s1197_s18, 16  ;;  %p755_p5 = scmp.lt.s32.totalorder %s1197_s18, %s1193_s16 }
  0x3b   :  { %p751_p3 = scmp.ne.s32.totalorder %s1197_s18, %s750_s14  ;;  %p756_p6 = scmp.lt.s32.totalorder %s1219_s7, %s750_s14 }
  0x3d   :  { %p757_p7 = por %p756_p6, %p755_p5 }
  0x3f   :  { %p758_p4 = pnand %p757_p7, %p751_p3 }
  0x41   :  { %761 = shalt.err (!%p758_p4)  }
  0x42   :  { %51 = dma.hbm_to_vmem [thread:$0]  %s38_s10, 16, %s1197_s18, [#allocation2 + $0x1] }
  0x43   :  { %s54_s15 = scalar_select %p53_p9, %s1195_s19, 0 }
  0x44   :  { %p73_p10 = scmp.gt.s32.totalorder %s1201_s22, 0  ;;  %p545_p11 = scmp.lt.s32.totalorder %s1201_s22, 127 }
  0x45   :  { %s1559_s15 = smov (!%p538_p8, %s54_s15), 127 }
  0x46   :  { %s74_s17 = scalar_select %p73_p10, %s1201_s22, 0 }
  0x47   :  { %s543_s0 = sshll.u32 %s1559_s15, 4 }
  0x48   :  { %s58_s24 = scalar_lea.hbm %s1543_s1, %s543_s0 }
  0x49   :  { %s762_s25 = scalar_lea.hbm %s58_s24, 16  ;;  %p765_p12 = scmp.lt.u32.totalorder %s58_s24, %s1543_s1 }
  0x4a   :  { %p763_p4 = scmp.ne.s32.totalorder %s58_s24, %s762_s25  ;;  %p766_p13 = scmp.lt.u32.totalorder %s1210_s3, %s762_s25 }
  0x4b   :  { %p768_p9 = scmp.lt.u32.totalorder %s762_s25, %s58_s24 }
  0x4c   :  { %p767_p0 = por %p766_p13, %p765_p12 }
  0x4e   :  { %p769_p1 = por %p768_p9, %p767_p0 }
  0x50   :  { %p770_p2 = pnand %p769_p1, %p763_p4 }
  0x52   :  { %773 = shalt.err (!%p770_p2)  }
  0x53   :  { %s774_s18 = scalar_lea.vmem %s69_s21, 16  ;;  %p779_p3 = scmp.lt.s32.totalorder %s69_s21, %s1193_s16 }
  0x54   :  { %p775_p8 = scmp.ne.s32.totalorder %s69_s21, %s774_s18  ;;  %p780_p5 = scmp.lt.s32.totalorder %s1219_s7, %s774_s18 }
  0x56   :  { %p781_p6 = por %p780_p5, %p779_p3 }
  0x58   :  { %p782_p7 = pnand %p781_p6, %p775_p8 }
  0x5a   :  { %785 = shalt.err (!%p782_p7)  }
  0x5b   :  { %71 = dma.hbm_to_vmem [thread:$0]  %s58_s24, 16, %s69_s21, [#allocation2 + $0x2] }
  0x5c   :  { %s1561_s17 = smov (!%p545_p11, %s74_s17), 127  ;;  %s1160_s19 = smov [#allocation5 + $0x3]  }
  0x5d   :  { %s88_s28 = sshll.u32 %s1160_s19, 4  ;;  %s1262_s29 = sld [smem:[#allocation4 + $0x4]]  ;;  %s89_s28 = int_to_ptr.vmem [resolvable:$true] %s88_s28 }
  0x5e   :  { %s550_s30 = sshll.u32 %s1561_s17, 4 }
  0x5f   :  { %s78_s6 = scalar_lea.hbm %s1543_s1, %s550_s30 }
  0x60   :  { %s786_s8 = scalar_lea.hbm %s78_s6, 16  ;;  %p789_p4 = scmp.lt.u32.totalorder %s78_s6, %s1543_s1 }
  0x61   :  { %p787_p10 = scmp.ne.s32.totalorder %s78_s6, %s786_s8  ;;  %p790_p12 = scmp.lt.u32.totalorder %s1210_s3, %s786_s8 }
  0x62   :  { %p792_p0 = scmp.lt.u32.totalorder %s786_s8, %s78_s6 }
  0x63   :  { %p791_p13 = por %p790_p12, %p789_p4 }
  0x65   :  { %p793_p11 = por %p792_p0, %p791_p13 }
  0x67   :  { %p794_p9 = pnand %p793_p11, %p787_p10 }
  0x69   :  { %797 = shalt.err (!%p794_p9)  }
  0x6a   :  { %s798_s21 = scalar_lea.vmem %s89_s28, 16  ;;  %p803_p2 = scmp.lt.s32.totalorder %s89_s28, %s1193_s16 }
  0x6b   :  { %p799_p1 = scmp.ne.s32.totalorder %s89_s28, %s798_s21  ;;  %p804_p8 = scmp.lt.s32.totalorder %s1219_s7, %s798_s21 }
  0x6d   :  { %p805_p3 = por %p804_p8, %p803_p2 }
  0x6f   :  { %p806_p5 = pnand %p805_p3, %p799_p1 }
  0x71   :  { %809 = shalt.err (!%p806_p5)  }
  0x72   :  { %91 = dma.hbm_to_vmem [thread:$0]  %s78_s6, 16, %s89_s28, [#allocation2 + $0x3] }
  0x73   :  { %s1161_s22 = smov [#allocation5 + $0x4]   ;;  %s1273_s12 = sld [smem:[#allocation4 + $0x5]] }
  0x74   :  { %s108_s11 = sshll.u32 %s1161_s22, 4  ;;  %p93_p6 = scmp.gt.s32.totalorder %s1262_s29, 0  ;;  %s1275_s11 = int_to_ptr.vmem [resolvable:$true] %s108_s11 }
  0x75   :  { %p552_p7 = scmp.lt.s32.totalorder %s1262_s29, 127  ;;  %s1162_s13 = smov [#allocation5 + $0x5]  }
  0x76   :  { %s128_s14 = sshll.u32 %s1162_s13, 4  ;;  %s1279_s15 = sld [smem:[#allocation4 + $0x6]]  ;;  %s1282_s14 = int_to_ptr.vmem [resolvable:$true] %s128_s14 }
  0x77   :  { %s1563_s29 = smov (!%p93_p6, %s1262_s29), 0  ;;  %s1163_s0 = smov [#allocation5 + $0x6]  }
  0x78   :  { %s1565_s29 = smov (!%p552_p7, %s1563_s29), 127  ;;  %s148_s20 = sshll.u32 %s1163_s0, 4  ;;  %s1309_s20 = int_to_ptr.vmem [resolvable:$true] %s148_s20 }
  0x79   :  { %p113_p10 = scmp.gt.s32.totalorder %s1273_s12, 0  ;;  %s557_s17 = sshll.u32 %s1565_s29, 4 }
  0x7a   :  { %s98_s25 = scalar_lea.hbm %s1543_s1, %s557_s17 }
  0x7b   :  { %s810_s26 = scalar_lea.hbm %s98_s25, 16  ;;  %p813_p0 = scmp.lt.u32.totalorder %s98_s25, %s1543_s1 }
  0x7c   :  { %p133_p12 = scmp.gt.s32.totalorder %s1279_s15, 0  ;;  %p811_p13 = scmp.ne.s32.totalorder %s98_s25, %s810_s26 }
  0x7d   :  { %p814_p11 = scmp.lt.u32.totalorder %s1210_s3, %s810_s26  ;;  %p816_p1 = scmp.lt.u32.totalorder %s810_s26, %s98_s25 }
  0x7f   :  { %p815_p9 = por %p814_p11, %p813_p0 }
  0x81   :  { %p817_p2 = por %p816_p1, %p815_p9 }
  0x83   :  { %p818_p8 = pnand %p817_p2, %p811_p13 }
  0x85   :  { %821 = shalt.err (!%p818_p8)  }
  0x86   :  { %s822_s19 = scalar_lea.vmem %s1275_s11, 16  ;;  %p827_p5 = scmp.lt.s32.totalorder %s1275_s11, %s1193_s16 }
  0x87   :  { %p823_p3 = scmp.ne.s32.totalorder %s1275_s11, %s822_s19  ;;  %p828_p6 = scmp.lt.s32.totalorder %s1219_s7, %s822_s19 }
  0x89   :  { %p829_p7 = por %p828_p6, %p827_p5 }
  0x8b   :  { %p830_p4 = pnand %p829_p7, %p823_p3 }
  0x8d   :  { %833 = shalt.err (!%p830_p4)  }
  0x8e   :  { %111 = dma.hbm_to_vmem [thread:$0]  %s98_s25, 16, %s1275_s11, [#allocation2 + $0x4] }
  0x8f   :  { %s114_s28 = scalar_select %p113_p10, %s1273_s12, 0 }
  0x90   :  { %s134_s29 = scalar_select %p133_p12, %s1279_s15, 0 }
  0x91   :  { %p1546_p13 = scmp.lt.s32.totalorder %s1273_s12, 127  ;;  %p566_p0 = scmp.lt.s32.totalorder %s1279_s15, 127 }
  0x92   :  { %s1311_s4 = sld [smem:[#allocation4 + $0x7]] }
  0x93   :  { %s1567_s28 = smov (!%p1546_p13, %s114_s28), 127 }
  0x94   :  { %s564_s30 = sshll.u32 %s1567_s28, 4 }
  0x95   :  { %s118_s8 = scalar_lea.hbm %s1543_s1, %s564_s30 }
  0x96   :  { %s834_s9 = scalar_lea.hbm %s118_s8, 16  ;;  %p837_p10 = scmp.lt.u32.totalorder %s118_s8, %s1543_s1 }
  0x97   :  { %p835_p4 = scmp.ne.s32.totalorder %s118_s8, %s834_s9  ;;  %p838_p11 = scmp.lt.u32.totalorder %s1210_s3, %s834_s9 }
  0x98   :  { %p840_p9 = scmp.lt.u32.totalorder %s834_s9, %s118_s8 }
  0x99   :  { %p839_p12 = por %p838_p11, %p837_p10 }
  0x9b   :  { %p841_p1 = por %p840_p9, %p839_p12 }
  0x9d   :  { %p842_p2 = pnand %p841_p1, %p835_p4 }
  0x9f   :  { %845 = shalt.err (!%p842_p2)  }
  0xa0   :  { %s846_s22 = scalar_lea.vmem %s1282_s14, 16  ;;  %p851_p3 = scmp.lt.s32.totalorder %s1282_s14, %s1193_s16 }
  0xa1   :  { %p847_p8 = scmp.ne.s32.totalorder %s1282_s14, %s846_s22  ;;  %p852_p5 = scmp.lt.s32.totalorder %s1219_s7, %s846_s22 }
  0xa3   :  { %p853_p6 = por %p852_p5, %p851_p3 }
  0xa5   :  { %p854_p7 = pnand %p853_p6, %p847_p8 }
  0xa7   :  { %857 = shalt.err (!%p854_p7)  }
  0xa8   :  { %131 = dma.hbm_to_vmem [thread:$0]  %s118_s8, 16, %s1282_s14, [#allocation2 + $0x5] }
  0xa9   :  { %s1569_s29 = smov (!%p566_p0, %s134_s29), 127  ;;  %s1164_s11 = smov [#allocation5 + $0x7]  }
  0xaa   :  { %s168_s12 = sshll.u32 %s1164_s11, 4  ;;  %s1328_s13 = sld [smem:[#allocation4 + $0x8]]  ;;  %s1330_s12 = int_to_ptr.vmem [resolvable:$true] %s168_s12 }
  0xab   :  { %s571_s17 = sshll.u32 %s1569_s29, 4  ;;  %p153_p13 = scmp.gt.s32.totalorder %s1311_s4, 0 }
  0xac   :  { %s138_s24 = scalar_lea.hbm %s1543_s1, %s571_s17 }
  0xad   :  { %s858_s25 = scalar_lea.hbm %s138_s24, 16  ;;  %p861_p10 = scmp.lt.u32.totalorder %s138_s24, %s1543_s1 }
  0xae   :  { %p859_p4 = scmp.ne.s32.totalorder %s138_s24, %s858_s25  ;;  %p862_p11 = scmp.lt.u32.totalorder %s1210_s3, %s858_s25 }
  0xaf   :  { %p864_p12 = scmp.lt.u32.totalorder %s858_s25, %s138_s24 }
  0xb0   :  { %p863_p0 = por %p862_p11, %p861_p10 }
  0xb2   :  { %p865_p9 = por %p864_p12, %p863_p0 }
  0xb4   :  { %p866_p1 = pnand %p865_p9, %p859_p4 }
  0xb6   :  { %869 = shalt.err (!%p866_p1)  }
  0xb7   :  { %s870_s14 = scalar_lea.vmem %s1309_s20, 16  ;;  %p875_p8 = scmp.lt.s32.totalorder %s1309_s20, %s1193_s16 }
  0xb8   :  { %p871_p2 = scmp.ne.s32.totalorder %s1309_s20, %s870_s14  ;;  %p876_p3 = scmp.lt.s32.totalorder %s1219_s7, %s870_s14 }
  0xba   :  { %p877_p5 = por %p876_p3, %p875_p8 }
  0xbc   :  { %p878_p6 = pnand %p877_p5, %p871_p2 }
  0xbe   :  { %881 = shalt.err (!%p878_p6)  }
  0xbf   :  { %151 = dma.hbm_to_vmem [thread:$0]  %s138_s24, 16, %s1309_s20, [#allocation2 + $0x6] }
  0xc0   :  { %s154_s15 = scalar_select %p153_p13, %s1311_s4, 0 }
  0xc1   :  { %p573_p7 = scmp.lt.s32.totalorder %s1311_s4, 127  ;;  %p173_p4 = scmp.gt.s32.totalorder %s1328_s13, 0 }
  0xc2   :  { %p580_p10 = scmp.lt.s32.totalorder %s1328_s13, 127  ;;  %s1165_s28 = smov [#allocation5 + $0x8]  }
  0xc3   :  { %s1571_s15 = smov (!%p573_p7, %s154_s15), 127  ;;  %s188_s29 = sshll.u32 %s1165_s28, 4  ;;  %s1356_s29 = int_to_ptr.vmem [resolvable:$true] %s188_s29 }
  0xc4   :  { %s174_s18 = scalar_select %p173_p4, %s1328_s13, 0 }
  0xc5   :  { %s578_s19 = sshll.u32 %s1571_s15, 4 }
  0xc6   :  { %s158_s6 = scalar_lea.hbm %s1543_s1, %s578_s19 }
  0xc7   :  { %s882_s8 = scalar_lea.hbm %s158_s6, 16  ;;  %p885_p13 = scmp.lt.u32.totalorder %s158_s6, %s1543_s1 }
  0xc8   :  { %p883_p11 = scmp.ne.s32.totalorder %s158_s6, %s882_s8  ;;  %p886_p0 = scmp.lt.u32.totalorder %s1210_s3, %s882_s8 }
  0xc9   :  { %p888_p9 = scmp.lt.u32.totalorder %s882_s8, %s158_s6 }
  0xca   :  { %p887_p12 = por %p886_p0, %p885_p13 }
  0xcc   :  { %p889_p1 = por %p888_p9, %p887_p12 }
  0xce   :  { %p890_p2 = pnand %p889_p1, %p883_p11 }
  0xd0   :  { %893 = shalt.err (!%p890_p2)  }
  0xd1   :  { %s894_s4 = scalar_lea.vmem %s1330_s12, 16  ;;  %p899_p3 = scmp.lt.s32.totalorder %s1330_s12, %s1193_s16 }
  0xd2   :  { %p895_p8 = scmp.ne.s32.totalorder %s1330_s12, %s894_s4  ;;  %p900_p5 = scmp.lt.s32.totalorder %s1219_s7, %s894_s4 }
  0xd4   :  { %p901_p6 = por %p900_p5, %p899_p3 }
  0xd6   :  { %p902_p7 = pnand %p901_p6, %p895_p8 }
  0xd8   :  { %905 = shalt.err (!%p902_p7)  }
  0xd9   :  { %171 = dma.hbm_to_vmem [thread:$0]  %s158_s6, 16, %s1330_s12, [#allocation2 + $0x7] }
  0xda   :  { %s1573_s18 = smov (!%p580_p10, %s174_s18), 127  ;;  %s1370_s10 = sld [smem:[#allocation4 + $0x9]] }
  0xdb   :  { %s585_s21 = sshll.u32 %s1573_s18, 4  ;;  %s1166_s22 = smov [#allocation5 + $0x9]  }
  0xdc   :  { %s208_s11 = sshll.u32 %s1166_s22, 4  ;;  %s178_s23 = scalar_lea.hbm %s1543_s1, %s585_s21  ;;  %s1375_s11 = int_to_ptr.vmem [resolvable:$true] %s208_s11 }
  0xdd   :  { %s906_s24 = scalar_lea.hbm %s178_s23, 16  ;;  %p909_p11 = scmp.lt.u32.totalorder %s178_s23, %s1543_s1 }
  0xde   :  { %p907_p4 = scmp.ne.s32.totalorder %s178_s23, %s906_s24  ;;  %p910_p13 = scmp.lt.u32.totalorder %s1210_s3, %s906_s24 }
  0xdf   :  { %p912_p10 = scmp.lt.u32.totalorder %s906_s24, %s178_s23 }
  0xe0   :  { %p911_p0 = por %p910_p13, %p909_p11 }
  0xe2   :  { %p913_p12 = por %p912_p10, %p911_p0 }
  0xe4   :  { %p914_p9 = pnand %p913_p12, %p907_p4 }
  0xe6   :  { %917 = shalt.err (!%p914_p9)  }
  0xe7   :  { %s918_s12 = scalar_lea.vmem %s1356_s29, 16  ;;  %p923_p2 = scmp.lt.s32.totalorder %s1356_s29, %s1193_s16 }
  0xe8   :  { %p919_p1 = scmp.ne.s32.totalorder %s1356_s29, %s918_s12  ;;  %p924_p8 = scmp.lt.s32.totalorder %s1219_s7, %s918_s12 }
  0xea   :  { %p925_p3 = por %p924_p8, %p923_p2 }
  0xec   :  { %p926_p5 = pnand %p925_p3, %p919_p1 }
  0xee   :  { %929 = shalt.err (!%p926_p5)  }
  0xef   :  { %191 = dma.hbm_to_vmem [thread:$0]  %s178_s23, 16, %s1356_s29, [#allocation2 + $0x8] }
  0xf0   :  { %s1387_s13 = sld [smem:[#allocation4 + $0xa]]  ;;  %s1167_s27 = smov [#allocation5 + $0xa]  }
  0xf1   :  { %s228_s14 = sshll.u32 %s1167_s27, 4  ;;  %s1389_s15 = sld [smem:[#allocation4 + $0xb]]  ;;  %s1393_s14 = int_to_ptr.vmem [resolvable:$true] %s228_s14 }
  0xf2   :  { %p193_p6 = scmp.gt.s32.totalorder %s1370_s10, 0  ;;  %p587_p7 = scmp.lt.s32.totalorder %s1370_s10, 127 }
  0xf3   :  { %s1168_s18 = smov [#allocation5 + $0xb]   ;;  %s1398_s28 = sld [smem:[#allocation4 + $0xc]] }
  0xf4   :  { %s1575_s10 = smov (!%p193_p6, %s1370_s10), 0  ;;  %s1396_s19 = sshll.u32 %s1168_s18, 4  ;;  %s1428_s19 = int_to_ptr.vmem [resolvable:$true] %s1396_s19 }
  0xf5   :  { %s1577_s10 = smov (!%p587_p7, %s1575_s10), 127 }
  0xf6   :  { %p213_p4 = scmp.gt.s32.totalorder %s1387_s13, 0  ;;  %s592_s29 = sshll.u32 %s1577_s10, 4 }
  0xf7   :  { %p233_p13 = scmp.gt.s32.totalorder %s1389_s15, 0  ;;  %s198_s6 = scalar_lea.hbm %s1543_s1, %s592_s29 }
  0xf8   :  { %s930_s8 = scalar_lea.hbm %s198_s6, 16  ;;  %p933_p12 = scmp.lt.u32.totalorder %s198_s6, %s1543_s1 }
  0xf9   :  { %p931_p10 = scmp.ne.s32.totalorder %s198_s6, %s930_s8  ;;  %p934_p9 = scmp.lt.u32.totalorder %s1210_s3, %s930_s8 }
  0xfa   :  { %p936_p2 = scmp.lt.u32.totalorder %s930_s8, %s198_s6 }
  0xfb   :  { %p935_p1 = por %p934_p9, %p933_p12 }
  0xfd   :  { %p937_p8 = por %p936_p2, %p935_p1 }
  0xff   :  { %p938_p3 = pnand %p937_p8, %p931_p10 }
 0x101   :  { %941 = shalt.err (!%p938_p3)  }
 0x102   :  { %s942_s4 = scalar_lea.vmem %s1375_s11, 16  ;;  %p947_p6 = scmp.lt.s32.totalorder %s1375_s11, %s1193_s16 }
 0x103   :  { %p943_p5 = scmp.ne.s32.totalorder %s1375_s11, %s942_s4  ;;  %p948_p7 = scmp.lt.s32.totalorder %s1219_s7, %s942_s4 }
 0x105   :  { %p949_p0 = por %p948_p7, %p947_p6 }
 0x107   :  { %p950_p11 = pnand %p949_p0, %p943_p5 }
 0x109   :  { %953 = shalt.err (!%p950_p11)  }
 0x10a   :  { %211 = dma.hbm_to_vmem [thread:$0]  %s198_s6, 16, %s1375_s11, [#allocation2 + $0x9] }
 0x10b   :  { %s214_s10 = scalar_select %p213_p4, %s1387_s13, 0 }
 0x10c   :  { %s234_s21 = scalar_select %p233_p13, %s1389_s15, 0 }
 0x10d   :  { %p1547_p10 = scmp.lt.s32.totalorder %s1387_s13, 127  ;;  %p1548_p12 = scmp.lt.s32.totalorder %s1389_s15, 127 }
 0x10f   :  { %s1579_s10 = smov (!%p1547_p10, %s214_s10), 127  ;;  %s1581_s21 = smov (!%p1548_p12, %s234_s21), 127 }
 0x110   :  { %s599_s22 = sshll.u32 %s1579_s10, 4  ;;  %s606_s24 = sshll.u32 %s1581_s21, 4 }
 0x111   :  { %s218_s23 = scalar_lea.hbm %s1543_s1, %s599_s22 }
 0x112   :  { %s954_s25 = scalar_lea.hbm %s218_s23, 16  ;;  %p957_p4 = scmp.lt.u32.totalorder %s218_s23, %s1543_s1 }
 0x113   :  { %p955_p11 = scmp.ne.s32.totalorder %s218_s23, %s954_s25  ;;  %p958_p0 = scmp.lt.u32.totalorder %s1210_s3, %s954_s25 }
 0x114   :  { %p960_p9 = scmp.lt.u32.totalorder %s954_s25, %s218_s23 }
 0x115   :  { %p959_p13 = por %p958_p0, %p957_p4 }
 0x117   :  { %p961_p1 = por %p960_p9, %p959_p13 }
 0x119   :  { %p962_p2 = pnand %p961_p1, %p955_p11 }
 0x11b   :  { %965 = shalt.err (!%p962_p2)  }
 0x11c   :  { %s966_s12 = scalar_lea.vmem %s1393_s14, 16  ;;  %p971_p3 = scmp.lt.s32.totalorder %s1393_s14, %s1193_s16 }
 0x11d   :  { %p967_p8 = scmp.ne.s32.totalorder %s1393_s14, %s966_s12  ;;  %p972_p5 = scmp.lt.s32.totalorder %s1219_s7, %s966_s12 }
 0x11f   :  { %p973_p6 = por %p972_p5, %p971_p3 }
 0x121   :  { %p974_p7 = pnand %p973_p6, %p967_p8 }
 0x123   :  { %977 = shalt.err (!%p974_p7)  }
 0x124   :  { %231 = dma.hbm_to_vmem [thread:$0]  %s218_s23, 16, %s1393_s14, [#allocation2 + $0xa] }
 0x125   :  { %s238_s15 = scalar_lea.hbm %s1543_s1, %s606_s24  ;;  %p253_p10 = scmp.gt.s32.totalorder %s1398_s28, 0 }
 0x126   :  { %s978_s18 = scalar_lea.hbm %s238_s15, 16  ;;  %p981_p11 = scmp.lt.u32.totalorder %s238_s15, %s1543_s1 }
 0x127   :  { %p979_p12 = scmp.ne.s32.totalorder %s238_s15, %s978_s18  ;;  %p982_p4 = scmp.lt.u32.totalorder %s1210_s3, %s978_s18 }
 0x128   :  { %p984_p13 = scmp.lt.u32.totalorder %s978_s18, %s238_s15 }
 0x129   :  { %p983_p0 = por %p982_p4, %p981_p11 }
 0x12b   :  { %p985_p9 = por %p984_p13, %p983_p0 }
 0x12d   :  { %p986_p1 = pnand %p985_p9, %p979_p12 }
 0x12f   :  { %989 = shalt.err (!%p986_p1)  }
 0x130   :  { %s990_s14 = scalar_lea.vmem %s1428_s19, 16  ;;  %p995_p8 = scmp.lt.s32.totalorder %s1428_s19, %s1193_s16 }
 0x131   :  { %p991_p2 = scmp.ne.s32.totalorder %s1428_s19, %s990_s14  ;;  %p996_p3 = scmp.lt.s32.totalorder %s1219_s7, %s990_s14 }
 0x133   :  { %p997_p5 = por %p996_p3, %p995_p8 }
 0x135   :  { %p998_p6 = pnand %p997_p5, %p991_p2 }
 0x137   :  { %1001 = shalt.err (!%p998_p6)  }
 0x138   :  { %251 = dma.hbm_to_vmem [thread:$0]  %s238_s15, 16, %s1428_s19, [#allocation2 + $0xb] }
 0x139   :  { %s254_s5 = scalar_select %p253_p10, %s1398_s28, 0 }
 0x13a   :  { %p608_p7 = scmp.lt.s32.totalorder %s1398_s28, 127  ;;  %s1169_s6 = smov [#allocation5 + $0xc]  }
 0x13b   :  { %s268_s8 = sshll.u32 %s1169_s6, 4  ;;  %s1461_s9 = sld [smem:[#allocation4 + $0xd]]  ;;  %s269_s8 = int_to_ptr.vmem [resolvable:$true] %s268_s8 }
 0x13c   :  { %s1583_s5 = smov (!%p608_p7, %s254_s5), 127  ;;  %s1170_s22 = smov [#allocation5 + $0xd]  }
 0x13d   :  { %s613_s20 = sshll.u32 %s1583_s5, 4  ;;  %s288_s17 = sshll.u32 %s1170_s22, 4  ;;  %s289_s17 = int_to_ptr.vmem [resolvable:$true] %s288_s17 }
 0x13e   :  { %s258_s21 = scalar_lea.hbm %s1543_s1, %s613_s20 }
 0x13f   :  { %s1002_s0 = scalar_lea.hbm %s258_s21, 16  ;;  %p1005_p10 = scmp.lt.u32.totalorder %s258_s21, %s1543_s1 }
 0x140   :  { %p1003_p12 = scmp.ne.s32.totalorder %s258_s21, %s1002_s0  ;;  %p1006_p11 = scmp.lt.u32.totalorder %s1210_s3, %s1002_s0 }
 0x141   :  { %p1008_p0 = scmp.lt.u32.totalorder %s1002_s0, %s258_s21 }
 0x142   :  { %p1007_p4 = por %p1006_p11, %p1005_p10 }
 0x144   :  { %p1009_p13 = por %p1008_p0, %p1007_p4 }
 0x146   :  { %p1010_p9 = pnand %p1009_p13, %p1003_p12 }
 0x148   :  { %1013 = shalt.err (!%p1010_p9)  }
 0x149   :  { %s1014_s28 = scalar_lea.vmem %s269_s8, 16  ;;  %p1019_p2 = scmp.lt.s32.totalorder %s269_s8, %s1193_s16 }
 0x14a   :  { %p1015_p1 = scmp.ne.s32.totalorder %s269_s8, %s1014_s28  ;;  %p1020_p8 = scmp.lt.s32.totalorder %s1219_s7, %s1014_s28 }
 0x14c   :  { %p1021_p3 = por %p1020_p8, %p1019_p2 }
 0x14e   :  { %p1022_p5 = pnand %p1021_p3, %p1015_p1 }
 0x150   :  { %1025 = shalt.err (!%p1022_p5)  }
 0x151   :  { %271 = dma.hbm_to_vmem [thread:$0]  %s258_s21, 16, %s269_s8, [#allocation2 + $0xc] }
 0x152   :  { %p273_p6 = scmp.gt.s32.totalorder %s1461_s9, 0  ;;  %p615_p7 = scmp.lt.s32.totalorder %s1461_s9, 127 }
 0x153   :  { %s1474_s24 = sld [smem:[#allocation4 + $0xe]]  ;;  %s1171_s25 = smov [#allocation5 + $0xe]  }
 0x154   :  { %s1585_s9 = smov (!%p273_p6, %s1461_s9), 0  ;;  %s308_s26 = sshll.u32 %s1171_s25, 4  ;;  %s1479_s26 = int_to_ptr.vmem [resolvable:$true] %s308_s26 }
 0x155   :  { %s1477_s11 = sld [smem:[#allocation4 + $0xf]]  ;;  %s1587_s9 = smov (!%p615_p7, %s1585_s9), 127 }
 0x156   :  { %s620_s12 = sshll.u32 %s1587_s9, 4 }
 0x157   :  { %s278_s15 = scalar_lea.hbm %s1543_s1, %s620_s12 }
 0x158   :  { %s1026_s18 = scalar_lea.hbm %s278_s15, 16  ;;  %p1029_p11 = scmp.lt.u32.totalorder %s278_s15, %s1543_s1 }
 0x159   :  { %p293_p12 = scmp.gt.s32.totalorder %s1474_s24, 0  ;;  %p1027_p10 = scmp.ne.s32.totalorder %s278_s15, %s1026_s18 }
 0x15a   :  { %p1030_p4 = scmp.lt.u32.totalorder %s1210_s3, %s1026_s18  ;;  %p1032_p13 = scmp.lt.u32.totalorder %s1026_s18, %s278_s15 }
 0x15c   :  { %p1031_p0 = por %p1030_p4, %p1029_p11 }
 0x15e   :  { %p1033_p9 = por %p1032_p13, %p1031_p0 }
 0x160   :  { %p1034_p1 = pnand %p1033_p9, %p1027_p10 }
 0x162   :  { %1037 = shalt.err (!%p1034_p1)  }
 0x163   :  { %s1038_s14 = scalar_lea.vmem %s289_s17, 16  ;;  %p1043_p8 = scmp.lt.s32.totalorder %s289_s17, %s1193_s16 }
 0x164   :  { %p1039_p2 = scmp.ne.s32.totalorder %s289_s17, %s1038_s14  ;;  %p1044_p3 = scmp.lt.s32.totalorder %s1219_s7, %s1038_s14 }
 0x166   :  { %p1045_p5 = por %p1044_p3, %p1043_p8 }
 0x168   :  { %p1046_p6 = pnand %p1045_p5, %p1039_p2 }
 0x16a   :  { %1049 = shalt.err (!%p1046_p6)  }
 0x16b   :  { %291 = dma.hbm_to_vmem [thread:$0]  %s278_s15, 16, %s289_s17, [#allocation2 + $0xd] }
 0x16c   :  { %s294_s5 = scalar_select %p293_p12, %s1474_s24, 0 }
 0x16d   :  { %p622_p7 = scmp.lt.s32.totalorder %s1474_s24, 127  ;;  %p313_p10 = scmp.gt.s32.totalorder %s1477_s11, 0 }
 0x16e   :  { %p629_p11 = scmp.lt.s32.totalorder %s1477_s11, 127  ;;  %s1172_s10 = smov [#allocation5 + $0xf]  }
 0x16f   :  { %s1589_s5 = smov (!%p622_p7, %s294_s5), 127  ;;  %s328_s21 = sshll.u32 %s1172_s10, 4  ;;  %s329_s21 = int_to_ptr.vmem [resolvable:$true] %s328_s21 }
 0x170   :  { %s314_s6 = scalar_select %p313_p10, %s1477_s11, 0 }
 0x171   :  { %s627_s8 = sshll.u32 %s1589_s5, 4 }
 0x172   :  { %s298_s4 = scalar_lea.hbm %s1543_s1, %s627_s8 }
 0x173   :  { %s1050_s22 = scalar_lea.hbm %s298_s4, 16  ;;  %p1053_p0 = scmp.lt.u32.totalorder %s298_s4, %s1543_s1 }
 0x174   :  { %p1051_p4 = scmp.ne.s32.totalorder %s298_s4, %s1050_s22  ;;  %p1054_p13 = scmp.lt.u32.totalorder %s1210_s3, %s1050_s22 }
 0x175   :  { %p1056_p9 = scmp.lt.u32.totalorder %s1050_s22, %s298_s4 }
 0x176   :  { %p1055_p12 = por %p1054_p13, %p1053_p0 }
 0x178   :  { %p1057_p1 = por %p1056_p9, %p1055_p12 }
 0x17a   :  { %p1058_p2 = pnand %p1057_p1, %p1051_p4 }
 0x17c   :  { %1061 = shalt.err (!%p1058_p2)  }
 0x17d   :  { %s1062_s23 = scalar_lea.vmem %s1479_s26, 16  ;;  %p1067_p3 = scmp.lt.s32.totalorder %s1479_s26, %s1193_s16 }
 0x17e   :  { %p1063_p8 = scmp.ne.s32.totalorder %s1479_s26, %s1062_s23  ;;  %p1068_p5 = scmp.lt.s32.totalorder %s1219_s7, %s1062_s23 }
 0x180   :  { %p1069_p6 = por %p1068_p5, %p1067_p3 }
 0x182   :  { %p1070_p7 = pnand %p1069_p6, %p1063_p8 }
 0x184   :  { %1073 = shalt.err (!%p1070_p7)  }
 0x185   :  { %311 = dma.hbm_to_vmem [thread:$0]  %s298_s4, 16, %s1479_s26, [#allocation2 + $0xe] }
 0x186   :  { %s1591_s6 = smov (!%p629_p11, %s314_s6), 127 }
 0x187   :  { %s634_s19 = sshll.u32 %s1591_s6, 4 }
 0x188   :  { %s318_s25 = scalar_lea.hbm %s1543_s1, %s634_s19 }
 0x189   :  { %s1074_s12 = scalar_lea.hbm %s318_s25, 16  ;;  %p1077_p4 = scmp.lt.u32.totalorder %s318_s25, %s1543_s1 }
 0x18a   :  { %p1075_p10 = scmp.ne.s32.totalorder %s318_s25, %s1074_s12  ;;  %p1078_p0 = scmp.lt.u32.totalorder %s1210_s3, %s1074_s12 }
 0x18b   :  { %p1080_p12 = scmp.lt.u32.totalorder %s1074_s12, %s318_s25 }
 0x18c   :  { %p1079_p13 = por %p1078_p0, %p1077_p4 }
 0x18e   :  { %p1081_p9 = por %p1080_p12, %p1079_p13 }
 0x190   :  { %p1082_p1 = pnand %p1081_p9, %p1075_p10 }
 0x192   :  { %1085 = shalt.err (!%p1082_p1)  }
 0x193   :  { %s1086_s26 = scalar_lea.vmem %s329_s21, 16  ;;  %p1091_p2 = scmp.lt.s32.totalorder %s329_s21, %s1193_s16 }
 0x194   :  { %p1087_p11 = scmp.ne.s32.totalorder %s329_s21, %s1086_s26  ;;  %p1092_p8 = scmp.lt.s32.totalorder %s1219_s7, %s1086_s26 }
 0x196   :  { %p1093_p3 = por %p1092_p8, %p1091_p2 }
 0x198   :  { %p1094_p5 = pnand %p1093_p3, %p1087_p11 }
 0x19a   :  { %1097 = shalt.err (!%p1094_p5)  }
 0x19b   :  { %331 = dma.hbm_to_vmem [thread:$0]  %s318_s25, 16, %s329_s21, [#allocation2 + $0xf] }
 0x19c   :  { %1122 = dma.done.wait [#allocation2], 16 }
 0x19d   :  { %1123 = vsyncadd [#allocation2], 4294967280 }
 0x19e   :  { %1124 = dma.done.wait [#allocation2 + $0x1], 16 }
 0x19f   :  { %1125 = vsyncadd [#allocation2 + $0x1], 4294967280 }
 0x1a0   :  { %1126 = dma.done.wait [#allocation2 + $0x2], 16 }
 0x1a1   :  { %1127 = vsyncadd [#allocation2 + $0x2], 4294967280 }
 0x1a2   :  { %1128 = dma.done.wait [#allocation2 + $0x3], 16 }
 0x1a3   :  { %1129 = vsyncadd [#allocation2 + $0x3], 4294967280 }
 0x1a4   :  { %1130 = dma.done.wait [#allocation2 + $0x4], 16 }
 0x1a5   :  { %1131 = vsyncadd [#allocation2 + $0x4], 4294967280 }
 0x1a6   :  { %1132 = dma.done.wait [#allocation2 + $0x5], 16 }
 0x1a7   :  { %1133 = vsyncadd [#allocation2 + $0x5], 4294967280 }
 0x1a8   :  { %1134 = dma.done.wait [#allocation2 + $0x6], 16 }
 0x1a9   :  { %1135 = vsyncadd [#allocation2 + $0x6], 4294967280 }
 0x1aa   :  { %1136 = dma.done.wait [#allocation2 + $0x7], 16 }
 0x1ab   :  { %1137 = vsyncadd [#allocation2 + $0x7], 4294967280 }
 0x1ac   :  { %1138 = dma.done.wait [#allocation2 + $0x8], 16 }
 0x1ad   :  { %1139 = vsyncadd [#allocation2 + $0x8], 4294967280 }
 0x1ae   :  { %1140 = dma.done.wait [#allocation2 + $0x9], 16 }
 0x1af   :  { %1141 = vsyncadd [#allocation2 + $0x9], 4294967280 }
 0x1b0   :  { %1142 = dma.done.wait [#allocation2 + $0xa], 16 }
 0x1b1   :  { %1143 = vsyncadd [#allocation2 + $0xa], 4294967280 }
 0x1b2   :  { %1144 = dma.done.wait [#allocation2 + $0xb], 16 }
 0x1b3   :  { %1145 = vsyncadd [#allocation2 + $0xb], 4294967280 }
 0x1b4   :  { %1146 = dma.done.wait [#allocation2 + $0xc], 16 }
 0x1b5   :  { %1147 = vsyncadd [#allocation2 + $0xc], 4294967280 }
 0x1b6   :  { %1148 = dma.done.wait [#allocation2 + $0xd], 16 }
 0x1b7   :  { %1149 = vsyncadd [#allocation2 + $0xd], 4294967280 }
 0x1b8   :  { %1150 = dma.done.wait [#allocation2 + $0xe], 16 }
 0x1b9   :  { %1151 = vsyncadd [#allocation2 + $0xe], 4294967280 }
 0x1ba   :  { %1152 = dma.done.wait [#allocation2 + $0xf], 16 }
 0x1bb   :  { %1153 = vsyncadd [#allocation2 + $0xf], 4294967280  ;;  %p1099_p6 = scmp.ne.s32.totalorder %s1193_s16, %s1219_s7  ;;  %p1104_p7 = scmp.lt.s32.totalorder %s1219_s7, %s1219_s7 }
 0x1bc   :  { %p1549_p10 = scmp.lt.s32.totalorder %s1193_s16, %s1193_s16 }
 0x1be   :  { %p1105_p4 = por %p1104_p7, %p1549_p10 }
 0x1c0   :  { %p1106_p0 = pnand %p1105_p4, %p1099_p6 }
 0x1c2   :  { %1109 = shalt.err (!%p1106_p0)
}
 0x1c3   :  { %s1110_s11 = scalar_lea.hbm %s1544_s2, 256 }
 0x1c4   :  { %p1111_p13 = scmp.ne.s32.totalorder %s1544_s2, %s1110_s11  ;;  %p1114_p12 = scmp.lt.u32.totalorder %s1110_s11, %s1544_s2 }
 0x1c6   :  { %p1116_p9 = pnand %p1114_p12, %p1111_p13 }
 0x1c8   :  { %1119 = shalt.err (!%p1116_p9)
}
 0x1c9   :  { %s1173_s14 = smov 128   ;;  %s1174_s7 = smov 8  }
 0x1ca   :  { %376 = dma.vmem_to_hbm [thread:$0]  %s1193_s16, 256, %s1544_s2, [#allocation6], %s1173_s14, %s1173_s14, %s1174_s7  }
 0x1cb   :  { %1154 = dma.done.wait [#allocation6], 256  }
 0x1cc   :  { %1155 = vsyncadd [#allocation6], 4294967040 }
 0x1cd   :  { %380 = vsyncpa [#allocation6], 1 }
 0x1ce   :  { %381 = vsyncmov [#allocation2] }
 0x1d1   :  { %s382_s8 = vpop.sfrf %381 }
 0x1d2   :  { %p635_p1 = scmp.ne.s32.totalorder %s382_s8, 0 }
 0x1d4   :  { %386 = shalt.err (%p635_p1)  }
 0x1d5   :  { %388 = vsyncmov [#allocation2 + $0x1] }
 0x1d8   :  { %s389_s9 = vpop.sfrf %388 }
 0x1d9   :  { %p636_p11 = scmp.ne.s32.totalorder %s389_s9, 0 }
 0x1db   :  { %393 = shalt.err (%p636_p11)  }
 0x1dc   :  { %395 = vsyncmov [#allocation2 + $0x2] }
 0x1df   :  { %s396_s20 = vpop.sfrf %395 }
 0x1e0   :  { %p637_p2 = scmp.ne.s32.totalorder %s396_s20, 0 }
 0x1e2   :  { %400 = shalt.err (%p637_p2)  }
 0x1e3   :  { %402 = vsyncmov [#allocation2 + $0x3] }
 0x1e6   :  { %s403_s4 = vpop.sfrf %402 }
 0x1e7   :  { %p638_p8 = scmp.ne.s32.totalorder %s403_s4, 0 }
 0x1e9   :  { %407 = shalt.err (%p638_p8)  }
 0x1ea   :  { %409 = vsyncmov [#allocation2 + $0x4] }
 0x1ed   :  { %s410_s2 = vpop.sfrf %409 }
 0x1ee   :  { %p639_p3 = scmp.ne.s32.totalorder %s410_s2, 0 }
 0x1f0   :  { %414 = shalt.err (%p639_p3)  }
 0x1f1   :  { %416 = vsyncmov [#allocation2 + $0x5] }
 0x1f4   :  { %s417_s16 = vpop.sfrf %416 }
 0x1f5   :  { %p640_p5 = scmp.ne.s32.totalorder %s417_s16, 0 }
 0x1f7   :  { %421 = shalt.err (%p640_p5)  }
 0x1f8   :  { %423 = vsyncmov [#allocation2 + $0x6] }
 0x1fb   :  { %s424_s10 = vpop.sfrf %423 }
 0x1fc   :  { %p641_p6 = scmp.ne.s32.totalorder %s424_s10, 0 }
 0x1fe   :  { %428 = shalt.err (%p641_p6)  }
 0x1ff   :  { %430 = vsyncmov [#allocation2 + $0x7] }
 0x202   :  { %s431_s21 = vpop.sfrf %430 }
 0x203   :  { %p642_p7 = scmp.ne.s32.totalorder %s431_s21, 0 }
 0x205   :  { %435 = shalt.err (%p642_p7)  }
 0x206   :  { %437 = vsyncmov [#allocation2 + $0x8] }
 0x209   :  { %s438_s22 = vpop.sfrf %437 }
 0x20a   :  { %p643_p10 = scmp.ne.s32.totalorder %s438_s22, 0 }
 0x20c   :  { %442 = shalt.err (%p643_p10)  }
 0x20d   :  { %444 = vsyncmov [#allocation2 + $0x9] }
 0x210   :  { %s445_s17 = vpop.sfrf %444 }
 0x211   :  { %p644_p4 = scmp.ne.s32.totalorder %s445_s17, 0 }
 0x213   :  { %449 = shalt.err (%p644_p4)  }
 0x214   :  { %451 = vsyncmov [#allocation2 + $0xa] }
 0x217   :  { %s452_s0 = vpop.sfrf %451 }
 0x218   :  { %p645_p0 = scmp.ne.s32.totalorder %s452_s0, 0 }
 0x21a   :  { %456 = shalt.err (%p645_p0)  }
 0x21b   :  { %458 = vsyncmov [#allocation2 + $0xb] }
 0x21e   :  { %s459_s23 = vpop.sfrf %458 }
 0x21f   :  { %p646_p13 = scmp.ne.s32.totalorder %s459_s23, 0 }
 0x221   :  { %463 = shalt.err (%p646_p13)  }
 0x222   :  { %465 = vsyncmov [#allocation2 + $0xc] }
 0x225   :  { %s466_s19 = vpop.sfrf %465 }
 0x226   :  { %p647_p12 = scmp.ne.s32.totalorder %s466_s19, 0 }
 0x228   :  { %470 = shalt.err (%p647_p12)  }
 0x229   :  { %472 = vsyncmov [#allocation2 + $0xd] }
 0x22c   :  { %s473_s28 = vpop.sfrf %472 }
 0x22d   :  { %p648_p9 = scmp.ne.s32.totalorder %s473_s28, 0 }
 0x22f   :  { %477 = shalt.err (%p648_p9)  }
 0x230   :  { %479 = vsyncmov [#allocation2 + $0xe] }
 0x233   :  { %s480_s24 = vpop.sfrf %479 }
 0x234   :  { %p649_p1 = scmp.ne.s32.totalorder %s480_s24, 0 }
 0x236   :  { %484 = shalt.err (%p649_p1)  }
 0x237   :  { %486 = vsyncmov [#allocation2 + $0xf] }
 0x23a   :  { %s487_s25 = vpop.sfrf %486 }
 0x23b   :  { %p650_p11 = scmp.ne.s32.totalorder %s487_s25, 0 }
 0x23d   :  { %491 = shalt.err (%p650_p11)  }

</bundles_post_ra>
